<compile_context>
chip_gen: v7x
topology: tpu7x:2x2x1
jax: 0.10.0
libtpu: 0.0.40
codegen_flags: <defaults>
</compile_context>

<pallas_src>
import functools

import jax
import jax.numpy as jnp
from jax.experimental import pallas as pl
from jax.experimental.pallas import tpu as pltpu

_LANE = 128                      # lane width; all feature dims padded to this
_TM = 512                        # A_hat row-tile cap (parallel axis)
_TK = 2048                       # A_hat col-tile cap (reduction axis), bf16
_XW_RESIDENT_BYTES = 8 * 1024 * 1024   # keep XW VMEM-resident up to this size
_VMEM_LIMIT = 32 * 1024 * 1024   # safe on v5e/v6e/v7x; worst-case use ~20 MiB


def _round_up(x, m):
    return ((x + m - 1) // m) * m


def _pad2d(a, rows, cols):
    r, c = a.shape
    if r == rows and c == cols:
        return a
    return jnp.pad(a, ((0, rows - r), (0, cols - c)))


def _pad_nodes(n):
    """Pad N to the smallest granularity that still allows big tiles."""
    n = max(n, 1)
    if n <= 512:
        return _round_up(n, _LANE)
    if n <= 2048:
        return _round_up(n, 256)
    return _round_up(n, 512)


def _pick_tile(n_pad, cap):
    """Largest multiple of 128 <= cap that evenly divides n_pad."""
    t = max(_LANE, min(cap, n_pad))
    t -= t % _LANE
    while n_pad % t:
        t -= _LANE
    return t


# ---------------------------------------------------------------------------
# Pallas kernels
# ---------------------------------------------------------------------------

def _xw_kernel(x_ref, w_ref, o_ref):
    """XW = X_tile @ W, W VMEM-resident, output cast to o_ref.dtype (bf16)."""
    y = jnp.dot(x_ref[...], w_ref[...], preferred_element_type=jnp.float32)
    o_ref[...] = y.astype(o_ref.dtype)


def _gcn_prop_kernel(*refs, tk, xw_resident, fuse_dense):
    """out[i] = relu(sum_k A[i,k] @ XW[k] + b)  (optionally) @ Wd + bd.

    grid = (row tiles, k reduction).  A / XW are bf16, accumulation is f32.
    """
    if fuse_dense:
        a_ref, xw_ref, b_ref, wd_ref, bd_ref, o_ref, acc_ref = refs
    else:
        a_ref, xw_ref, b_ref, o_ref, acc_ref = refs

    k = pl.program_id(1)

    @pl.when(k == 0)
    def _():
        acc_ref[...] = jnp.zeros_like(acc_ref)

    if xw_resident:
        # XW lives whole in VMEM (constant block index => single DMA); slice
        # the current reduction chunk out of it.
        off = pl.multiple_of(k * tk, tk)
        xw = xw_ref[pl.ds(off, tk), :]
    else:
        xw = xw_ref[...]
    acc_ref[...] += jnp.dot(a_ref[...], xw,
                            preferred_element_type=jnp.float32)

    @pl.when(k == pl.num_programs(1) - 1)
    def _():
        h = jnp.maximum(acc_ref[...] + b_ref[...], 0.0)
        if fuse_dense:
            o_ref[...] = (jnp.dot(h, wd_ref[...],
                                  preferred_element_type=jnp.float32)
                          + bd_ref[...])
        else:
            o_ref[...] = h


def _merge_dense_kernel(s_ref, c_ref, wt_ref, wb_ref, b_ref, o_ref):
    """dense(relu(cat([s, c]))) == relu(s) @ Wt + relu(c) @ Wb + b."""
    s = jnp.maximum(s_ref[...], 0.0)
    c = jnp.maximum(c_ref[...], 0.0)
    o_ref[...] = (jnp.dot(s, wt_ref[...], preferred_element_type=jnp.float32)
                  + jnp.dot(c, wb_ref[...], preferred_element_type=jnp.float32)
                  + b_ref[...])


# ---------------------------------------------------------------------------
# pallas_call wrappers (padded domain)
# ---------------------------------------------------------------------------

def xw_matmul(x, w, *, out_dtype=jnp.bfloat16):
    """x: (Np, Fi_p) f32, w: (Fi_p, Fo_p) f32 -> (Np, Fo_p) out_dtype."""
    n_pad, fi = x.shape
    fo = w.shape[1]
    tm = _pick_tile(n_pad, _TM)
    grid = (n_pad // tm,)
    return pl.pallas_call(
        _xw_kernel,
        out_shape=jax.ShapeDtypeStruct((n_pad, fo), out_dtype),
        grid_spec=pltpu.PrefetchScalarGridSpec(
            num_scalar_prefetch=0,
            grid=grid,
            in_specs=[pl.BlockSpec((tm, fi), lambda i: (i, 0)),
                      pl.BlockSpec((fi, fo), lambda i: (0, 0))],
            out_specs=pl.BlockSpec((tm, fo), lambda i: (i, 0))),
        compiler_params=pltpu.CompilerParams(
            dimension_semantics=("parallel",),
            vmem_limit_bytes=_VMEM_LIMIT),
        cost_estimate=pl.CostEstimate(
            flops=2 * n_pad * fi * fo,
            transcendentals=0,
            bytes_accessed=(4 * (n_pad * fi + fi * fo)
                            + jnp.dtype(out_dtype).itemsize * n_pad * fo)),
    )(x, w)


def gcn_propagate(a, xw, b, wd=None, bd=None):
    """relu(A_hat @ XW + b), optionally fused with trailing dense (wd, bd).

    a:  (Np, Np)  bf16 normalized adjacency (streamed; dominant HBM traffic)
    xw: (Np, F_p) bf16 precomputed X @ W (VMEM-resident when it fits)
    b:  (1, F_p)  f32 conv bias (resident)
    wd: (F_p, Fo) f32 / bd: (1, Fo) f32  optional fused branch-head dense
    """
    n_pad = a.shape[0]
    f = xw.shape[1]
    # >=2 row blocks (when n_pad allows) so "parallel" shards across v7x TCs.
    tm = _pick_tile(n_pad, min(_TM, max(_LANE, n_pad // 2)))
    tk = _pick_tile(n_pad, _TK)
    grid = (n_pad // tm, n_pad // tk)
    fo = f if wd is None else wd.shape[1]

    xw_resident = n_pad * f * xw.dtype.itemsize <= _XW_RESIDENT_BYTES
    if xw_resident:
        # Constant block index: Pallas DMAs XW once, no per-row-tile re-stream.
        xw_spec = pl.BlockSpec((n_pad, f), lambda i, k: (0, 0))
        xw_bytes = xw.dtype.itemsize * n_pad * f
    else:
        xw_spec = pl.BlockSpec((tk, f), lambda i, k: (k, 0))
        xw_bytes = xw.dtype.itemsize * (n_pad // tm) * n_pad * f

    in_specs = [
        pl.BlockSpec((tm, tk), lambda i, k: (i, k)),   # A_hat tile (bf16)
        xw_spec,                                       # XW (bf16)
        pl.BlockSpec((1, f), lambda i, k: (0, 0)),     # conv bias (resident)
    ]
    # TODO(synk): on v6e, pipeline_mode=pl.Buffered(3) on the A_hat spec can
    # hide DMA jitter for another few %; left at the default depth here.
    args = [a, xw, b]
    flops = 2 * n_pad * n_pad * f
    byts = (a.dtype.itemsize * n_pad * n_pad + xw_bytes
            + 4 * (n_pad * fo + f))
    if wd is None:
        fuse_dense = False
    else:
        fuse_dense = True
        in_specs += [pl.BlockSpec((f, fo), lambda i, k: (0, 0)),
                     pl.BlockSpec((1, fo), lambda i, k: (0, 0))]
        args += [wd, bd]
        flops += 2 * n_pad * f * fo
        byts += 4 * (f * fo + fo)

    kernel = functools.partial(_gcn_prop_kernel, tk=tk,
                               xw_resident=xw_resident, fuse_dense=fuse_dense)
    return pl.pallas_call(
        kernel,
        out_shape=jax.ShapeDtypeStruct((n_pad, fo), jnp.float32),
        grid_spec=pltpu.PrefetchScalarGridSpec(
            num_scalar_prefetch=0,
            grid=grid,
            in_specs=in_specs,
            out_specs=pl.BlockSpec((tm, fo), lambda i, k: (i, 0)),
            scratch_shapes=[pltpu.VMEM((tm, f), jnp.float32)]),
        compiler_params=pltpu.CompilerParams(
            dimension_semantics=("parallel", "arbitrary"),
            vmem_limit_bytes=_VMEM_LIMIT),
        cost_estimate=pl.CostEstimate(flops=flops, transcendentals=0,
                                      bytes_accessed=byts),
    )(*args)


def merge_dense(s, c, wt, wb, b):
    """result = dense(relu(cat([s, c]))) without materializing the concat."""
    n_pad, fi = s.shape
    fo = wt.shape[1]
    tm = _pick_tile(n_pad, _TM)
    grid = (n_pad // tm,)
    return pl.pallas_call(
        _merge_dense_kernel,
        out_shape=jax.ShapeDtypeStruct((n_pad, fo), jnp.float32),
        grid_spec=pltpu.PrefetchScalarGridSpec(
            num_scalar_prefetch=0,
            grid=grid,
            in_specs=[pl.BlockSpec((tm, fi), lambda i: (i, 0)),
                      pl.BlockSpec((tm, fi), lambda i: (i, 0)),
                      pl.BlockSpec((fi, fo), lambda i: (0, 0)),
                      pl.BlockSpec((fi, fo), lambda i: (0, 0)),
                      pl.BlockSpec((1, fo), lambda i: (0, 0))],
            out_specs=pl.BlockSpec((tm, fo), lambda i: (i, 0))),
        compiler_params=pltpu.CompilerParams(
            dimension_semantics=("parallel",),
            vmem_limit_bytes=_VMEM_LIMIT),
        cost_estimate=pl.CostEstimate(
            flops=4 * n_pad * fi * fo,
            transcendentals=0,
            bytes_accessed=4 * (2 * n_pad * fi + 2 * fi * fo + n_pad * fo)),
    )(s, c, wt, wb, b)


# ---------------------------------------------------------------------------
# Glue: GCN normalization (matches torch_geometric gcn_norm with self-loops)
# ---------------------------------------------------------------------------

def gcn_norm_dense_adj(edge_index, edge_weight, num_nodes, num_nodes_pad):
    src = edge_index[0]
    dst = edge_index[1]
    loop = jnp.arange(num_nodes, dtype=edge_index.dtype)
    src = jnp.concatenate([src, loop])
    dst = jnp.concatenate([dst, loop])
    w = jnp.concatenate([edge_weight,
                         jnp.ones((num_nodes,), dtype=edge_weight.dtype)])
    deg = jnp.zeros((num_nodes,), dtype=jnp.float32).at[dst].add(w)
    dinv = jnp.where(deg > 0, jax.lax.rsqrt(deg), 0.0)
    norm = (dinv[src] * w * dinv[dst]).astype(jnp.bfloat16)
    # out[target] = sum_{edges s->t} norm * x[source]  =>  A_hat[t, s] += norm
    # Built directly in bf16: halves the O(N^2) HBM write of the scatter.
    a_hat = jnp.zeros((num_nodes_pad, num_nodes_pad),
                      dtype=jnp.bfloat16).at[dst, src].add(norm)
    return a_hat
    # TODO(synk): for large sparse graphs the dense O(N^2) A_hat (and this XLA
    # scatter) should be replaced with a CSR scalar-prefetch SpMM kernel.


# ---------------------------------------------------------------------------
# Model (parameters + forward)
# ---------------------------------------------------------------------------

def init_gnn_params(key, ninput, noutput, nlayer):
    params = {"convs": []}
    nhidden = 16
    dims = [(ninput, nhidden)]
    for _ in range(nlayer - 1):
        dims.append((nhidden, nhidden * 2))
        nhidden *= 2
    for (fi, fo) in dims:
        key, kw, kb = jax.random.split(key, 3)
        w = jax.random.normal(kw, (fi, fo), jnp.float32) * (1.0 / jnp.sqrt(fi))
        b = jax.random.normal(kb, (fo,), jnp.float32) * 0.01
        params["convs"].append((w, b))
    key, kw, kb = jax.random.split(key, 3)
    params["dense_w"] = jax.random.normal(kw, (nhidden, noutput), jnp.float32) * (
        1.0 / jnp.sqrt(nhidden))
    params["dense_b"] = jax.random.normal(kb, (noutput,), jnp.float32) * 0.01
    return params


def init_vtxgnn_params(key, ninput, noutput, nlayer):
    k1, k2, k3, k4 = jax.random.split(key, 4)
    return {
        "sply": init_gnn_params(k1, ninput, noutput, nlayer),
        "cons": init_gnn_params(k2, ninput, noutput, nlayer),
        "dense_w": jax.random.normal(k3, (2 * noutput, noutput), jnp.float32) * (
            1.0 / jnp.sqrt(2 * noutput)),
        "dense_b": jax.random.normal(k4, (noutput,), jnp.float32) * 0.01,
    }


def gnn_forward_padded(params, x_pad, a_pad):
    """One GNN branch on the padded domain.  Returns (N_pad, Fo_pad) f32 with
    the first `noutput` columns valid (padded columns are exactly zero)."""
    # TODO(synk): nn.Dropout(p=0.5) is identity in eval mode; training-mode
    # stochastic dropout is intentionally not modeled here.
    convs = params["convs"]
    nconv = len(convs)
    dw, db = params["dense_w"], params["dense_b"]
    fi_d = _round_up(dw.shape[0], _LANE)
    fo_d = _round_up(dw.shape[1], _LANE)
    wd_p = _pad2d(dw, fi_d, fo_d)
    bd_p = _pad2d(db.reshape(1, -1), 1, fo_d)

    h = x_pad
    for li, (w, b) in enumerate(convs):
        fi_p = h.shape[1]
        fo_p = _round_up(w.shape[1], _LANE)
        w_p = _pad2d(w, fi_p, fo_p)
        b_p = _pad2d(b.reshape(1, -1), 1, fo_p)
        # hoisted X @ W, emitted in bf16 so the A_hat stream is fully bf16
        xw = xw_matmul(h, w_p, out_dtype=jnp.bfloat16)
        if li == nconv - 1:
            h = gcn_propagate(a_pad, xw, b_p, wd_p, bd_p)  # fused branch head
        else:
            h = gcn_propagate(a_pad, xw, b_p)
    return h


def vtxgnn_forward(params, x, sply_edge_index, sply_edge_weight,
                   cons_edge_index, cons_edge_weight):
    n, fin = x.shape
    nout = params["dense_b"].shape[0]
    n_pad = _pad_nodes(n)

    x_pad = _pad2d(x, n_pad, _round_up(fin, _LANE))
    a_sply = gcn_norm_dense_adj(sply_edge_index, sply_edge_weight, n, n_pad)
    a_cons = gcn_norm_dense_adj(cons_edge_index, cons_edge_weight, n, n_pad)

    sply_p = gnn_forward_padded(params["sply"], x_pad, a_sply)
    cons_p = gnn_forward_padded(params["cons"], x_pad, a_cons)

    # result = Linear(relu(cat([sply, cons])))
    #        = relu(sply) @ Wd[:nout] + relu(cons) @ Wd[nout:] + bd
    # fused in one kernel -> no concat/slice/re-pad HBM round trips.
    fo_b = sply_p.shape[1]
    fo_p = _round_up(nout, _LANE)
    wt_p = _pad2d(params["dense_w"][:nout], fo_b, fo_p)
    wb_p = _pad2d(params["dense_w"][nout:], fo_b, fo_p)
    bd_p = _pad2d(params["dense_b"].reshape(1, -1), 1, fo_p)
    res_p = merge_dense(sply_p, cons_p, wt_p, wb_p, bd_p)

    return res_p[:n, :nout], sply_p[:n, :nout], cons_p[:n, :nout]


# ---------------------------------------------------------------------------
# Main
# ---------------------------------------------------------------------------

if __name__ == "__main__":
    NINPUT, NOUTPUT, NLAYER = 4, 8, 3
    N_NODES, N_EDGES = 16, 32

    key = jax.random.PRNGKey(0)
    kx, ke1, kw1, ke2, kw2, kp = jax.random.split(key, 6)

    x = jax.random.normal(kx, (N_NODES, NINPUT), jnp.float32)

    sply_edge_index = jax.random.randint(ke1, (2, N_EDGES), 0, N_NODES, jnp.int32)
    sply_edge_weight = jax.random.uniform(kw1, (N_EDGES,), jnp.float32) + 0.1
    cons_edge_index = jax.random.randint(ke2, (2, N_EDGES), 0, N_NODES, jnp.int32)
    cons_edge_weight = jax.random.uniform(kw2, (N_EDGES,), jnp.float32) + 0.1

    params = init_vtxgnn_params(kp, NINPUT, NOUTPUT, NLAYER)

    fwd = jax.jit(vtxgnn_forward)
    result, sply, cons = fwd(params, x, sply_edge_index, sply_edge_weight,
                             cons_edge_index, cons_edge_weight)
    jax.block_until_ready((result, sply, cons))

    assert result.shape == (N_NODES, NOUTPUT)
    assert sply.shape == (N_NODES, NOUTPUT)
    assert cons.shape == (N_NODES, NOUTPUT)
    assert bool(jnp.all(jnp.isfinite(result)))
    print("KERNEL_OK")
</pallas_src>

<mosaic_0001>
module attributes {stable_mosaic.version = 11 : i64} {
  func.func private @main(%arg0: i32) attributes {dimension_semantics = [#tpu.dimension_semantics<core_parallel>], iteration_bounds = array<i64: 2>, tpu.core_type = #tpu.core_type<sc_scalar_subcore>, window_params = []} {
    return
  }
}

module attributes {stable_mosaic.version = 11 : i64} {
  func.func private @main(%arg0: i32) attributes {dimension_semantics = [#tpu.dimension_semantics<core_parallel>], iteration_bounds = array<i64: 2>, tpu.core_type = #tpu.core_type<sc_scalar_subcore>, window_params = []} {
    return
  }
}

module attributes {stable_mosaic.version = 11 : i64} {
  func.func @_gcn_prop_kernel(%arg0: i32, %arg1: i32, %arg2: memref<128x128xbf16, #tpu.memory_space<vmem>>, %arg3: memref<128x128xbf16, #tpu.memory_space<vmem>>, %arg4: memref<1x128xf32, #tpu.memory_space<vmem>>, %arg5: memref<128x128xf32, #tpu.memory_space<vmem>>, %arg6: memref<128x128xf32, #tpu.memory_space<vmem>>) attributes {dimension_semantics = [#tpu.dimension_semantics<parallel>, #tpu.dimension_semantics<arbitrary>], iteration_bounds = array<i64: 1, 1>, scalar_prefetch = 0 : i64, scratch_operands = 1 : i64, tpu.core_type = #tpu.core_type<tc>, window_params = [{transform_indices = @transform_0, window_bounds = array<i64: 128, 128>}, {pipeline_mode = #tpu.pipeline_mode<synchronous>, transform_indices = @transform_1, window_bounds = array<i64: 128, 128>}, {pipeline_mode = #tpu.pipeline_mode<synchronous>, transform_indices = @transform_2, window_bounds = array<i64: 1, 128>}, {transform_indices = @transform_3, window_bounds = array<i64: 128, 128>}]} {
    %c0_i32 = arith.constant 0 : i32
    %0 = arith.cmpi eq, %arg1, %c0_i32 : i32
    %1 = arith.extui %0 : i1 to i32
    %c0_i32_0 = arith.constant 0 : i32
    %2 = arith.cmpi ne, %1, %c0_i32_0 : i32
    scf.if %2 {
      %cst_9 = arith.constant 0.000000e+00 : f32
      %15 = vector.broadcast %cst_9 : f32 to vector<128x128xf32>
      %c0_10 = arith.constant 0 : index
      %c0_11 = arith.constant 0 : index
      %16 = vector.load %arg6[%c0_10, %c0_11] : memref<128x128xf32, #tpu.memory_space<vmem>>, vector<128x128xf32>
      tpu.vector_store %arg6[%c0_10, %c0_11], %15 {strides = array<i32>} : memref<128x128xf32, #tpu.memory_space<vmem>>, vector<128x128xf32>,
    } else {
    }
    %c128_i32 = arith.constant 128 : i32
    %3 = arith.muli %arg1, %c128_i32 : i32
    %4 = tpu.assume_multiple %3, 128 : i32
    %5 = arith.index_cast %4 : i32 to index
    %c0 = arith.constant 0 : index
    %6 = vector.load %arg3[%5, %c0] : memref<128x128xbf16, #tpu.memory_space<vmem>>, vector<128x128xbf16>
    %c0_1 = arith.constant 0 : index
    %c0_2 = arith.constant 0 : index
    %7 = vector.load %arg6[%c0_1, %c0_2] : memref<128x128xf32, #tpu.memory_space<vmem>>, vector<128x128xf32>
    %c0_3 = arith.constant 0 : index
    %c0_4 = arith.constant 0 : index
    %8 = vector.load %arg2[%c0_3, %c0_4] : memref<128x128xbf16, #tpu.memory_space<vmem>>, vector<128x128xbf16>
    %cst = arith.constant dense<0.000000e+00> : vector<128x128xf32>
    %9 = tpu.matmul %8, %6, %cst {dimension_numbers = #tpu.dot_dimension_numbers<[1], [0], [0], [1], [0, 0, 1, 1], [], []>} : vector<128x128xbf16>, vector<128x128xbf16>, vector<128x128xf32> -> vector<128x128xf32>
    %10 = arith.addf %7, %9 : vector<128x128xf32>
    %c0_5 = arith.constant 0 : index
    %c0_6 = arith.constant 0 : index
    %11 = vector.load %arg6[%c0_5, %c0_6] : memref<128x128xf32, #tpu.memory_space<vmem>>, vector<128x128xf32>
    tpu.vector_store %arg6[%c0_5, %c0_6], %10 {strides = array<i32>} : memref<128x128xf32, #tpu.memory_space<vmem>>, vector<128x128xf32>,
    %c0_i32_7 = arith.constant 0 : i32
    %12 = arith.cmpi eq, %arg1, %c0_i32_7 : i32
    %13 = arith.extui %12 : i1 to i32
    %c0_i32_8 = arith.constant 0 : i32
    %14 = arith.cmpi ne, %13, %c0_i32_8 : i32
    scf.if %14 {
      %c0_9 = arith.constant 0 : index
      %c0_10 = arith.constant 0 : index
      %15 = vector.load %arg6[%c0_9, %c0_10] : memref<128x128xf32, #tpu.memory_space<vmem>>, vector<128x128xf32>
      %c0_11 = arith.constant 0 : index
      %c0_12 = arith.constant 0 : index
      %16 = vector.load %arg4[%c0_11, %c0_12] : memref<1x128xf32, #tpu.memory_space<vmem>>, vector<1x128xf32>
      %17 = vector.broadcast %16 : vector<1x128xf32> to vector<128x128xf32>
      %18 = arith.addf %15, %17 : vector<128x128xf32>
      %cst_13 = arith.constant 0.000000e+00 : f32
      %19 = vector.broadcast %cst_13 : f32 to vector<128x128xf32>
      %20 = arith.maximumf %18, %19 : vector<128x128xf32>
      %c0_14 = arith.constant 0 : index
      %c0_15 = arith.constant 0 : index
      %21 = vector.load %arg5[%c0_14, %c0_15] : memref<128x128xf32, #tpu.memory_space<vmem>>, vector<128x128xf32>
      tpu.vector_store %arg5[%c0_14, %c0_15], %20 {strides = array<i32>} : memref<128x128xf32, #tpu.memory_space<vmem>>, vector<128x128xf32>,
    } else {
    }
    return
  }
  func.func @transform_0(%arg0: i32, %arg1: i32) -> (i32, i32) {
    %c0_i32 = arith.constant 0 : i32
    return %arg0, %arg1 : i32, i32
  }
  func.func @transform_1(%arg0: i32, %arg1: i32) -> (i32, i32) {
    %c0_i32 = arith.constant 0 : i32
    %c0_i32_0 = arith.constant 0 : i32
    %c0_i32_1 = arith.constant 0 : i32
    return %c0_i32, %c0_i32_0 : i32, i32
  }
  func.func @transform_2(%arg0: i32, %arg1: i32) -> (i32, i32) {
    %c0_i32 = arith.constant 0 : i32
    %c0_i32_0 = arith.constant 0 : i32
    %c0_i32_1 = arith.constant 0 : i32
    return %c0_i32, %c0_i32_0 : i32, i32
  }
  func.func @transform_3(%arg0: i32, %arg1: i32) -> (i32, i32) {
    %c0_i32 = arith.constant 0 : i32
    %c0_i32_0 = arith.constant 0 : i32
    return %arg0, %c0_i32 : i32, i32
  }
}

module attributes {stable_mosaic.version = 11 : i64} {
  func.func @_xw_kernel(%arg0: i32, %arg1: memref<128x128xf32, #tpu.memory_space<vmem>>, %arg2: memref<128x128xf32, #tpu.memory_space<vmem>>, %arg3: memref<128x128xbf16, #tpu.memory_space<vmem>>) attributes {dimension_semantics = [#tpu.dimension_semantics<parallel>], iteration_bounds = array<i64: 1>, scalar_prefetch = 0 : i64, scratch_operands = 0 : i64, tpu.core_type = #tpu.core_type<tc>, window_params = [{transform_indices = @transform_0, window_bounds = array<i64: 128, 128>}, {pipeline_mode = #tpu.pipeline_mode<synchronous>, transform_indices = @transform_1, window_bounds = array<i64: 128, 128>}, {transform_indices = @transform_2, window_bounds = array<i64: 128, 128>}]} {
    %c0 = arith.constant 0 : index
    %c0_0 = arith.constant 0 : index
    %0 = vector.load %arg1[%c0, %c0_0] : memref<128x128xf32, #tpu.memory_space<vmem>>, vector<128x128xf32>
    %c0_1 = arith.constant 0 : index
    %c0_2 = arith.constant 0 : index
    %1 = vector.load %arg2[%c0_1, %c0_2] : memref<128x128xf32, #tpu.memory_space<vmem>>, vector<128x128xf32>
    %cst = arith.constant dense<0.000000e+00> : vector<128x128xf32>
    %2 = tpu.matmul %0, %1, %cst {dimension_numbers = #tpu.dot_dimension_numbers<[1], [0], [0], [1], [0, 0, 1, 1], [], []>} : vector<128x128xf32>, vector<128x128xf32>, vector<128x128xf32> -> vector<128x128xf32>
    %3 = arith.truncf %2 : vector<128x128xf32> to vector<128x128xbf16>
    %c0_3 = arith.constant 0 : index
    %c0_4 = arith.constant 0 : index
    %4 = vector.load %arg3[%c0_3, %c0_4] : memref<128x128xbf16, #tpu.memory_space<vmem>>, vector<128x128xbf16>
    tpu.vector_store %arg3[%c0_3, %c0_4], %3 {strides = array<i32>} : memref<128x128xbf16, #tpu.memory_space<vmem>>, vector<128x128xbf16>,
    return
  }
  func.func @transform_0(%arg0: i32) -> (i32, i32) {
    %c0_i32 = arith.constant 0 : i32
    %c0_i32_0 = arith.constant 0 : i32
    return %arg0, %c0_i32 : i32, i32
  }
  func.func @transform_1(%arg0: i32) -> (i32, i32) {
    %c0_i32 = arith.constant 0 : i32
    %c0_i32_0 = arith.constant 0 : i32
    %c0_i32_1 = arith.constant 0 : i32
    return %c0_i32, %c0_i32_0 : i32, i32
  }
  func.func @transform_2(%arg0: i32) -> (i32, i32) {
    %c0_i32 = arith.constant 0 : i32
    %c0_i32_0 = arith.constant 0 : i32
    return %arg0, %c0_i32 : i32, i32
  }
}

module attributes {stable_mosaic.version = 11 : i64} {
  func.func @_merge_dense_kernel(%arg0: i32, %arg1: memref<128x128xf32, #tpu.memory_space<vmem>>, %arg2: memref<128x128xf32, #tpu.memory_space<vmem>>, %arg3: memref<128x128xf32, #tpu.memory_space<vmem>>, %arg4: memref<128x128xf32, #tpu.memory_space<vmem>>, %arg5: memref<1x128xf32, #tpu.memory_space<vmem>>, %arg6: memref<128x128xf32, #tpu.memory_space<vmem>>) attributes {dimension_semantics = [#tpu.dimension_semantics<parallel>], iteration_bounds = array<i64: 1>, scalar_prefetch = 0 : i64, scratch_operands = 0 : i64, tpu.core_type = #tpu.core_type<tc>, window_params = [{transform_indices = @transform_0, window_bounds = array<i64: 128, 128>}, {transform_indices = @transform_1, window_bounds = array<i64: 128, 128>}, {pipeline_mode = #tpu.pipeline_mode<synchronous>, transform_indices = @transform_2, window_bounds = array<i64: 128, 128>}, {pipeline_mode = #tpu.pipeline_mode<synchronous>, transform_indices = @transform_3, window_bounds = array<i64: 128, 128>}, {pipeline_mode = #tpu.pipeline_mode<synchronous>, transform_indices = @transform_4, window_bounds = array<i64: 1, 128>}, {transform_indices = @transform_5, window_bounds = array<i64: 128, 128>}]} {
    %c0 = arith.constant 0 : index
    %c0_0 = arith.constant 0 : index
    %0 = vector.load %arg1[%c0, %c0_0] : memref<128x128xf32, #tpu.memory_space<vmem>>, vector<128x128xf32>
    %cst = arith.constant 0.000000e+00 : f32
    %1 = vector.broadcast %cst : f32 to vector<128x128xf32>
    %2 = arith.maximumf %0, %1 : vector<128x128xf32>
    %c0_1 = arith.constant 0 : index
    %c0_2 = arith.constant 0 : index
    %3 = vector.load %arg2[%c0_1, %c0_2] : memref<128x128xf32, #tpu.memory_space<vmem>>, vector<128x128xf32>
    %cst_3 = arith.constant 0.000000e+00 : f32
    %4 = vector.broadcast %cst_3 : f32 to vector<128x128xf32>
    %5 = arith.maximumf %3, %4 : vector<128x128xf32>
    %c0_4 = arith.constant 0 : index
    %c0_5 = arith.constant 0 : index
    %6 = vector.load %arg3[%c0_4, %c0_5] : memref<128x128xf32, #tpu.memory_space<vmem>>, vector<128x128xf32>
    %cst_6 = arith.constant dense<0.000000e+00> : vector<128x128xf32>
    %7 = tpu.matmul %2, %6, %cst_6 {dimension_numbers = #tpu.dot_dimension_numbers<[1], [0], [0], [1], [0, 0, 1, 1], [], []>} : vector<128x128xf32>, vector<128x128xf32>, vector<128x128xf32> -> vector<128x128xf32>
    %c0_7 = arith.constant 0 : index
    %c0_8 = arith.constant 0 : index
    %8 = vector.load %arg4[%c0_7, %c0_8] : memref<128x128xf32, #tpu.memory_space<vmem>>, vector<128x128xf32>
    %cst_9 = arith.constant dense<0.000000e+00> : vector<128x128xf32>
    %9 = tpu.matmul %5, %8, %cst_9 {dimension_numbers = #tpu.dot_dimension_numbers<[1], [0], [0], [1], [0, 0, 1, 1], [], []>} : vector<128x128xf32>, vector<128x128xf32>, vector<128x128xf32> -> vector<128x128xf32>
    %10 = arith.addf %7, %9 : vector<128x128xf32>
    %c0_10 = arith.constant 0 : index
    %c0_11 = arith.constant 0 : index
    %11 = vector.load %arg5[%c0_10, %c0_11] : memref<1x128xf32, #tpu.memory_space<vmem>>, vector<1x128xf32>
    %12 = vector.broadcast %11 : vector<1x128xf32> to vector<128x128xf32>
    %13 = arith.addf %10, %12 : vector<128x128xf32>
    %c0_12 = arith.constant 0 : index
    %c0_13 = arith.constant 0 : index
    %14 = vector.load %arg6[%c0_12, %c0_13] : memref<128x128xf32, #tpu.memory_space<vmem>>, vector<128x128xf32>
    tpu.vector_store %arg6[%c0_12, %c0_13], %13 {strides = array<i32>} : memref<128x128xf32, #tpu.memory_space<vmem>>, vector<128x128xf32>,
    return
  }
  func.func @transform_0(%arg0: i32) -> (i32, i32) {
    %c0_i32 = arith.constant 0 : i32
    %c0_i32_0 = arith.constant 0 : i32
    return %arg0, %c0_i32 : i32, i32
  }
  func.func @transform_1(%arg0: i32) -> (i32, i32) {
    %c0_i32 = arith.constant 0 : i32
    %c0_i32_0 = arith.constant 0 : i32
    return %arg0, %c0_i32 : i32, i32
  }
  func.func @transform_2(%arg0: i32) -> (i32, i32) {
    %c0_i32 = arith.constant 0 : i32
    %c0_i32_0 = arith.constant 0 : i32
    %c0_i32_1 = arith.constant 0 : i32
    return %c0_i32, %c0_i32_0 : i32, i32
  }
  func.func @transform_3(%arg0: i32) -> (i32, i32) {
    %c0_i32 = arith.constant 0 : i32
    %c0_i32_0 = arith.constant 0 : i32
    %c0_i32_1 = arith.constant 0 : i32
    return %c0_i32, %c0_i32_0 : i32, i32
  }
  func.func @transform_4(%arg0: i32) -> (i32, i32) {
    %c0_i32 = arith.constant 0 : i32
    %c0_i32_0 = arith.constant 0 : i32
    %c0_i32_1 = arith.constant 0 : i32
    return %c0_i32, %c0_i32_0 : i32, i32
  }
  func.func @transform_5(%arg0: i32) -> (i32, i32) {
    %c0_i32 = arith.constant 0 : i32
    %c0_i32_0 = arith.constant 0 : i32
    return %arg0, %c0_i32 : i32, i32
  }
}

module attributes {stable_mosaic.version = 11 : i64} {
  func.func @_gcn_prop_kernel(%arg0: i32, %arg1: i32, %arg2: memref<128x128xbf16, #tpu.memory_space<vmem>>, %arg3: memref<128x128xbf16, #tpu.memory_space<vmem>>, %arg4: memref<1x128xf32, #tpu.memory_space<vmem>>, %arg5: memref<128x128xf32, #tpu.memory_space<vmem>>, %arg6: memref<1x128xf32, #tpu.memory_space<vmem>>, %arg7: memref<128x128xf32, #tpu.memory_space<vmem>>, %arg8: memref<128x128xf32, #tpu.memory_space<vmem>>) attributes {dimension_semantics = [#tpu.dimension_semantics<parallel>, #tpu.dimension_semantics<arbitrary>], iteration_bounds = array<i64: 1, 1>, scalar_prefetch = 0 : i64, scratch_operands = 1 : i64, tpu.core_type = #tpu.core_type<tc>, window_params = [{transform_indices = @transform_0, window_bounds = array<i64: 128, 128>}, {pipeline_mode = #tpu.pipeline_mode<synchronous>, transform_indices = @transform_1, window_bounds = array<i64: 128, 128>}, {pipeline_mode = #tpu.pipeline_mode<synchronous>, transform_indices = @transform_2, window_bounds = array<i64: 1, 128>}, {pipeline_mode = #tpu.pipeline_mode<synchronous>, transform_indices = @transform_3, window_bounds = array<i64: 128, 128>}, {pipeline_mode = #tpu.pipeline_mode<synchronous>, transform_indices = @transform_4, window_bounds = array<i64: 1, 128>}, {transform_indices = @transform_5, window_bounds = array<i64: 128, 128>}]} {
    %c0_i32 = arith.constant 0 : i32
    %0 = arith.cmpi eq, %arg1, %c0_i32 : i32
    %1 = arith.extui %0 : i1 to i32
    %c0_i32_0 = arith.constant 0 : i32
    %2 = arith.cmpi ne, %1, %c0_i32_0 : i32
    scf.if %2 {
      %cst_9 = arith.constant 0.000000e+00 : f32
      %15 = vector.broadcast %cst_9 : f32 to vector<128x128xf32>
      %c0_10 = arith.constant 0 : index
      %c0_11 = arith.constant 0 : index
      %16 = vector.load %arg8[%c0_10, %c0_11] : memref<128x128xf32, #tpu.memory_space<vmem>>, vector<128x128xf32>
      tpu.vector_store %arg8[%c0_10, %c0_11], %15 {strides = array<i32>} : memref<128x128xf32, #tpu.memory_space<vmem>>, vector<128x128xf32>,
    } else {
    }
    %c128_i32 = arith.constant 128 : i32
    %3 = arith.muli %arg1, %c128_i32 : i32
    %4 = tpu.assume_multiple %3, 128 : i32
    %5 = arith.index_cast %4 : i32 to index
    %c0 = arith.constant 0 : index
    %6 = vector.load %arg3[%5, %c0] : memref<128x128xbf16, #tpu.memory_space<vmem>>, vector<128x128xbf16>
    %c0_1 = arith.constant 0 : index
    %c0_2 = arith.constant 0 : index
    %7 = vector.load %arg8[%c0_1, %c0_2] : memref<128x128xf32, #tpu.memory_space<vmem>>, vector<128x128xf32>
    %c0_3 = arith.constant 0 : index
    %c0_4 = arith.constant 0 : index
    %8 = vector.load %arg2[%c0_3, %c0_4] : memref<128x128xbf16, #tpu.memory_space<vmem>>, vector<128x128xbf16>
    %cst = arith.constant dense<0.000000e+00> : vector<128x128xf32>
    %9 = tpu.matmul %8, %6, %cst {dimension_numbers = #tpu.dot_dimension_numbers<[1], [0], [0], [1], [0, 0, 1, 1], [], []>} : vector<128x128xbf16>, vector<128x128xbf16>, vector<128x128xf32> -> vector<128x128xf32>
    %10 = arith.addf %7, %9 : vector<128x128xf32>
    %c0_5 = arith.constant 0 : index
    %c0_6 = arith.constant 0 : index
    %11 = vector.load %arg8[%c0_5, %c0_6] : memref<128x128xf32, #tpu.memory_space<vmem>>, vector<128x128xf32>
    tpu.vector_store %arg8[%c0_5, %c0_6], %10 {strides = array<i32>} : memref<128x128xf32, #tpu.memory_space<vmem>>, vector<128x128xf32>,
    %c0_i32_7 = arith.constant 0 : i32
    %12 = arith.cmpi eq, %arg1, %c0_i32_7 : i32
    %13 = arith.extui %12 : i1 to i32
    %c0_i32_8 = arith.constant 0 : i32
    %14 = arith.cmpi ne, %13, %c0_i32_8 : i32
    scf.if %14 {
      %c0_9 = arith.constant 0 : index
      %c0_10 = arith.constant 0 : index
      %15 = vector.load %arg8[%c0_9, %c0_10] : memref<128x128xf32, #tpu.memory_space<vmem>>, vector<128x128xf32>
      %c0_11 = arith.constant 0 : index
      %c0_12 = arith.constant 0 : index
      %16 = vector.load %arg4[%c0_11, %c0_12] : memref<1x128xf32, #tpu.memory_space<vmem>>, vector<1x128xf32>
      %17 = vector.broadcast %16 : vector<1x128xf32> to vector<128x128xf32>
      %18 = arith.addf %15, %17 : vector<128x128xf32>
      %cst_13 = arith.constant 0.000000e+00 : f32
      %19 = vector.broadcast %cst_13 : f32 to vector<128x128xf32>
      %20 = arith.maximumf %18, %19 : vector<128x128xf32>
      %c0_14 = arith.constant 0 : index
      %c0_15 = arith.constant 0 : index
      %21 = vector.load %arg5[%c0_14, %c0_15] : memref<128x128xf32, #tpu.memory_space<vmem>>, vector<128x128xf32>
      %cst_16 = arith.constant dense<0.000000e+00> : vector<128x128xf32>
      %22 = tpu.matmul %20, %21, %cst_16 {dimension_numbers = #tpu.dot_dimension_numbers<[1], [0], [0], [1], [0, 0, 1, 1], [], []>} : vector<128x128xf32>, vector<128x128xf32>, vector<128x128xf32> -> vector<128x128xf32>
      %c0_17 = arith.constant 0 : index
      %c0_18 = arith.constant 0 : index
      %23 = vector.load %arg6[%c0_17, %c0_18] : memref<1x128xf32, #tpu.memory_space<vmem>>, vector<1x128xf32>
      %24 = vector.broadcast %23 : vector<1x128xf32> to vector<128x128xf32>
      %25 = arith.addf %22, %24 : vector<128x128xf32>
      %c0_19 = arith.constant 0 : index
      %c0_20 = arith.constant 0 : index
      %26 = vector.load %arg7[%c0_19, %c0_20] : memref<128x128xf32, #tpu.memory_space<vmem>>, vector<128x128xf32>
      tpu.vector_store %arg7[%c0_19, %c0_20], %25 {strides = array<i32>} : memref<128x128xf32, #tpu.memory_space<vmem>>, vector<128x128xf32>,
    } else {
    }
    return
  }
  func.func @transform_0(%arg0: i32, %arg1: i32) -> (i32, i32) {
    %c0_i32 = arith.constant 0 : i32
    return %arg0, %arg1 : i32, i32
  }
  func.func @transform_1(%arg0: i32, %arg1: i32) -> (i32, i32) {
    %c0_i32 = arith.constant 0 : i32
    %c0_i32_0 = arith.constant 0 : i32
    %c0_i32_1 = arith.constant 0 : i32
    return %c0_i32, %c0_i32_0 : i32, i32
  }
  func.func @transform_2(%arg0: i32, %arg1: i32) -> (i32, i32) {
    %c0_i32 = arith.constant 0 : i32
    %c0_i32_0 = arith.constant 0 : i32
    %c0_i32_1 = arith.constant 0 : i32
    return %c0_i32, %c0_i32_0 : i32, i32
  }
  func.func @transform_3(%arg0: i32, %arg1: i32) -> (i32, i32) {
    %c0_i32 = arith.constant 0 : i32
    %c0_i32_0 = arith.constant 0 : i32
    %c0_i32_1 = arith.constant 0 : i32
    return %c0_i32, %c0_i32_0 : i32, i32
  }
  func.func @transform_4(%arg0: i32, %arg1: i32) -> (i32, i32) {
    %c0_i32 = arith.constant 0 : i32
    %c0_i32_0 = arith.constant 0 : i32
    %c0_i32_1 = arith.constant 0 : i32
    return %c0_i32, %c0_i32_0 : i32, i32
  }
  func.func @transform_5(%arg0: i32, %arg1: i32) -> (i32, i32) {
    %c0_i32 = arith.constant 0 : i32
    %c0_i32_0 = arith.constant 0 : i32
    return %arg0, %c0_i32 : i32, i32
  }
}

</mosaic_0001>

<bundles_post_ra>
// kernel: vtxgnn_forward.19
= control target key start
LH: loop header
LB: loop body
LE: loop exit
PB: predicated region body
PF: predicated region fallthrough
CT: control target
= control target key end

     0   :  { %s622_s1 = inlined_call_operand.vmem [shape: f32[128,128], index: 1, kind: input, shape index: {}]   ;;  %s623_s0 = inlined_call_operand.vmem [shape: f32[128,128], index: 0, kind: input, shape index: {}]   ;;  %s624_s2 = inlined_call_operand.vmem [shape: bf16[128,128], index: 2, kind: output, shape index: {}]  }
   0x1   :  { %v27_v0 = vld [vmem:[%s622_s1] sm:$0xff]  ;;  %v28_v1 = vld [vmem:[%s622_s1 + $0x8] sm:$0xff]  ;;  %v29_v2 = vld [vmem:[%s622_s1 + $0x10] sm:$0xff] }
   0x2   :  { %v439_v3 = vpack.c.bf16 %v28_v1, %v27_v0  ;;  %v30_v4 = vld [vmem:[%s622_s1 + $0x18] sm:$0xff]  ;;  %v31_v6 = vld [vmem:[%s622_s1 + $0x20] sm:$0xff]  ;;  %v32_v7 = vld [vmem:[%s622_s1 + $0x28] sm:$0xff] }
   0x3   :  { %v443_v5 = vpack.c.bf16 %v30_v4, %v29_v2  ;;  %v447_v8 = vpack.c.bf16 %v32_v7, %v31_v6  ;;  %v11_v9 = vld [vmem:[%s623_s0] sm:$0xff]  ;;  %v33_v11 = vld [vmem:[%s622_s1 + $0x30] sm:$0xff]  ;;  %v34_v12 = vld [vmem:[%s622_s1 + $0x38] sm:$0xff] }
   0x4   :  { %440 = vmatprep.subr.bf16.mxu0 %v439_v3  ;;  %471 = vmatprep.subr.bf16.mxu1 %v439_v3  ;;  %v19_v10 = vld [vmem:[%s623_s0 + $0x40] sm:$0xff]  ;;  %v451_v13 = vpack.c.bf16 %v34_v12, %v33_v11  ;;  %v36_v15 = vld [vmem:[%s622_s1 + $0x48] sm:$0xff]  ;;  %v37_v17 = vld [vmem:[%s622_s1 + $0x50] sm:$0xff] }
   0x5   :  { %442 = vmatpush3.bf16.msra.mxu0 %v439_v3  ;;  %479 = vmatpush3.bf16.msra.mxu1 %v439_v3  ;;  %v35_v14 = vld [vmem:[%s622_s1 + $0x40] sm:$0xff]  ;;  %v38_v18 = vld [vmem:[%s622_s1 + $0x58] sm:$0xff]  ;;  %v40_v21 = vld [vmem:[%s622_s1 + $0x68] sm:$0xff] }
   0x6   :  { %444 = vmatprep.subr.bf16.mxu0 %v443_v5  ;;  %472 = vmatprep.subr.bf16.mxu1 %v443_v5  ;;  %v455_v16 = vpack.c.bf16 %v36_v15, %v35_v14  ;;  %v459_v19 = vpack.c.bf16 %v38_v18, %v37_v17  ;;  %v39_v20 = vld [vmem:[%s622_s1 + $0x60] sm:$0xff]  ;;  %v41_v23 = vld [vmem:[%s622_s1 + $0x70] sm:$0xff]  ;;  %v42_v24 = vld [vmem:[%s622_s1 + $0x78] sm:$0xff] }
   0x7   :  { %415 = vmatprep.mubr.f32.mxu0 %v11_v9  ;;  %427 = vmatprep.mubr.f32.mxu1 %v19_v10  ;;  %v463_v22 = vpack.c.bf16 %v40_v21, %v39_v20  ;;  %v467_v25 = vpack.c.bf16 %v42_v24, %v41_v23  ;;  %v12_v26 = vld [vmem:[%s623_s0 + $0x8] sm:$0xff]  ;;  %v13_v28 = vld [vmem:[%s623_s0 + $0x10] sm:$0xff]  ;;  %v14_v30 = vld [vmem:[%s623_s0 + $0x18] sm:$0xff] }
   0x8   :  { %v20_v27 = vld [vmem:[%s623_s0 + $0x48] sm:$0xff]  ;;  %v21_v29 = vld [vmem:[%s623_s0 + $0x50] sm:$0xff]  ;;  %v22_v31 = vld [vmem:[%s623_s0 + $0x58] sm:$0xff] }
   0x9   :  { %446 = vmatpush3.bf16.msra.mxu0 %v443_v5  ;;  %480 = vmatpush3.bf16.msra.mxu1 %v443_v5  ;;  %v15_v32 = vld [vmem:[%s623_s0 + $0x20] sm:$0xff]  ;;  %v16_v34 = vld [vmem:[%s623_s0 + $0x28] sm:$0xff]  ;;  %v17_v36 = vld [vmem:[%s623_s0 + $0x30] sm:$0xff] }
   0xa   :  { %448 = vmatprep.subr.bf16.mxu0 %v447_v8  ;;  %473 = vmatprep.subr.bf16.mxu1 %v447_v8  ;;  %v23_v33 = vld [vmem:[%s623_s0 + $0x60] sm:$0xff]  ;;  %v24_v35 = vld [vmem:[%s623_s0 + $0x68] sm:$0xff]  ;;  %v25_v37 = vld [vmem:[%s623_s0 + $0x70] sm:$0xff] }
   0xb   :  { %v18_v38 = vld [vmem:[%s623_s0 + $0x38] sm:$0xff] }
   0xc   :  { %v26_v39 = vld [vmem:[%s623_s0 + $0x78] sm:$0xff] }
   0xd   :  { %450 = vmatpush3.bf16.msra.mxu0 %v447_v8  ;;  %481 = vmatpush3.bf16.msra.mxu1 %v447_v8 }
   0xe   :  { %452 = vmatprep.subr.bf16.mxu0 %v451_v13  ;;  %474 = vmatprep.subr.bf16.mxu1 %v451_v13 }
  0x11   :  { %454 = vmatpush3.bf16.msra.mxu0 %v451_v13  ;;  %482 = vmatpush3.bf16.msra.mxu1 %v451_v13 }
  0x12   :  { %456 = vmatprep.subr.bf16.mxu0 %v455_v16  ;;  %475 = vmatprep.subr.bf16.mxu1 %v455_v16 }
  0x15   :  { %458 = vmatpush3.bf16.msra.mxu0 %v455_v16  ;;  %483 = vmatpush3.bf16.msra.mxu1 %v455_v16 }
  0x16   :  { %460 = vmatprep.subr.bf16.mxu0 %v459_v19  ;;  %476 = vmatprep.subr.bf16.mxu1 %v459_v19 }
  0x19   :  { %462 = vmatpush3.bf16.msra.mxu0 %v459_v19  ;;  %484 = vmatpush3.bf16.msra.mxu1 %v459_v19 }
  0x1a   :  { %464 = vmatprep.subr.bf16.mxu0 %v463_v22  ;;  %477 = vmatprep.subr.bf16.mxu1 %v463_v22 }
  0x1d   :  { %466 = vmatpush3.bf16.msra.mxu0 %v463_v22  ;;  %485 = vmatpush3.bf16.msra.mxu1 %v463_v22 }
  0x1e   :  { %468 = vmatprep.subr.bf16.mxu0 %v467_v25  ;;  %478 = vmatprep.subr.bf16.mxu1 %v467_v25 }
  0x21   :  { %470 = vmatpush3.bf16.msra.mxu0 %v467_v25  ;;  %486 = vmatpush3.bf16.msra.mxu1 %v467_v25 }
  0x24   :  { %416 = vmatmul.mubr.f32.vlgmr.msra.gmra.mrb[0].mxu0 %v12_v26  ;;  %428 = vmatmul.mubr.f32.vlgmr.msra.gmra.mrb[0].mxu1 %v20_v27 }
  0x25   :  { %418 = vmatprep.mubr.f32.mxu0 %v13_v28  ;;  %430 = vmatprep.mubr.f32.mxu1 %v21_v29 }
  0x28   :  { %419 = vmatmul.mubr.f32.gmra.mrb[2].mxu0 %v14_v30  ;;  %431 = vmatmul.mubr.f32.gmra.mrb[2].mxu1 %v22_v31 }
  0x29   :  { %421 = vmatprep.mubr.f32.mxu0 %v15_v32  ;;  %433 = vmatprep.mubr.f32.mxu1 %v23_v33 }
  0x2c   :  { %422 = vmatmul.mubr.f32.gmra.mrb[4].mxu0 %v16_v34  ;;  %434 = vmatmul.mubr.f32.gmra.mrb[4].mxu1 %v24_v35 }
  0x2d   :  { %424 = vmatprep.mubr.f32.mxu0 %v17_v36  ;;  %436 = vmatprep.mubr.f32.mxu1 %v25_v37 }
  0x30   :  { %425 = vmatmul.mubr.f32.gmra.mrb[6].mxu0 %v18_v38  ;;  %437 = vmatmul.mubr.f32.gmra.mrb[6].mxu1 %v26_v39 }
  0xf7   :  { %v417_v40 = vpop.f32.mrb[0].mxu0  ;;  %v429_v41 = vpop.f32.mrb[0].mxu1 }
  0xf8   :  { %v109_v42 = vpop.f32.mrb[1].mxu0  ;;  %v149_v43 = vpop.f32.mrb[1].mxu1 }
  0xf9   :  { %v307_v44 = vpack.c.bf16 %v417_v40, %v109_v42  ;;  %v327_v45 = vpack.c.bf16 %v429_v41, %v149_v43 }
  0xfb   :  { %308 = vst [vmem:[%s624_s2] sm:$0xff] %v307_v44   ;;  %347 = vst [vmem:[%s624_s2 + $0x20] sm:$0xff] %v327_v45   ;;  %v420_v46 = vpop.f32.mrb[2].mxu0  ;;  %v432_v47 = vpop.f32.mrb[2].mxu1 }
  0xfc   :  { %v119_v48 = vpop.f32.mrb[3].mxu0  ;;  %v159_v49 = vpop.f32.mrb[3].mxu1 }
  0xfd   :  { %v312_v50 = vpack.c.bf16 %v420_v46, %v119_v48  ;;  %v332_v51 = vpack.c.bf16 %v432_v47, %v159_v49 }
  0xff   :  { %344 = vst [vmem:[%s624_s2 + $0x8] sm:$0xff] %v312_v50   ;;  %348 = vst [vmem:[%s624_s2 + $0x28] sm:$0xff] %v332_v51   ;;  %v423_v52 = vpop.f32.mrb[4].mxu0  ;;  %v435_v53 = vpop.f32.mrb[4].mxu1 }
 0x100   :  { %v129_v54 = vpop.f32.mrb[5].mxu0  ;;  %v169_v55 = vpop.f32.mrb[5].mxu1 }
 0x101   :  { %v317_v56 = vpack.c.bf16 %v423_v52, %v129_v54  ;;  %v337_v57 = vpack.c.bf16 %v435_v53, %v169_v55 }
 0x103   :  { %345 = vst [vmem:[%s624_s2 + $0x10] sm:$0xff] %v317_v56   ;;  %349 = vst [vmem:[%s624_s2 + $0x30] sm:$0xff] %v337_v57   ;;  %v426_v58 = vpop.f32.mrb[6].mxu0  ;;  %v438_v59 = vpop.f32.mrb[6].mxu1 }
 0x104   :  { %v139_v60 = vpop.f32.mrb[7].mxu0  ;;  %v179_v61 = vpop.f32.mrb[7].mxu1 }
 0x105   :  { %v322_v62 = vpack.c.bf16 %v426_v58, %v139_v60  ;;  %v342_v63 = vpack.c.bf16 %v438_v59, %v179_v61 }
 0x107   :  { %346 = vst [vmem:[%s624_s2 + $0x18] sm:$0xff] %v322_v62   ;;  %350 = vst [vmem:[%s624_s2 + $0x38] sm:$0xff] %v342_v63  }

// kernel: vtxgnn_forward.20
= control target key start
LH: loop header
LB: loop body
LE: loop exit
PB: predicated region body
PF: predicated region fallthrough
CT: control target
= control target key end

     0   :  { %s609_s1 = inlined_call_operand.vmem [shape: bf16[128,128], index: 1, kind: input, shape index: {}]   ;;  %s610_s0 = inlined_call_operand.vmem [shape: bf16[128,128], index: 0, kind: input, shape index: {}]   ;;  %s611_s2 = inlined_call_operand.vmem [shape: f32[1,128], index: 2, kind: input, shape index: {}]   ;;  %s612_s3 = inlined_call_operand.vmem [shape: f32[128,128], index: 3, kind: output, shape index: {}]  }
   0x1   :  { %v474_v0 = vld [vmem:[%s609_s1] sm:$0xff]   ;;  %v475_v1 = vld [vmem:[%s609_s1 + $0x8] sm:$0xff]   ;;  %v476_v2 = vld [vmem:[%s609_s1 + $0x10] sm:$0xff]  }
   0x2   :  { %426 = vmatprep.subr.bf16.mxu0 %v474_v0  ;;  %458 = vmatprep.subr.bf16.mxu1 %v474_v0  ;;  %v477_v3 = vld [vmem:[%s609_s1 + $0x18] sm:$0xff]   ;;  %v482_v4 = vld [vmem:[%s610_s0] sm:$0xff]   ;;  %v479_v7 = vld [vmem:[%s609_s1 + $0x28] sm:$0xff]  }
   0x3   :  { %427 = vmatpush3.bf16.msra.mxu0 %v474_v0  ;;  %466 = vmatpush3.bf16.msra.mxu1 %v474_v0  ;;  %v483_v5 = vld [vmem:[%s610_s0 + $0x20] sm:$0xff]   ;;  %v480_v8 = vld [vmem:[%s609_s1 + $0x30] sm:$0xff]   ;;  %v481_v9 = vld [vmem:[%s609_s1 + $0x38] sm:$0xff]  }
   0x4   :  { %428 = vmatprep.subr.bf16.mxu0 %v475_v1  ;;  %459 = vmatprep.subr.bf16.mxu1 %v475_v1  ;;  %v478_v6 = vld [vmem:[%s609_s1 + $0x20] sm:$0xff]   ;;  %v484_v10 = vld [vmem:[%s610_s0 + $0x8] sm:$0xff]   ;;  %v486_v12 = vld [vmem:[%s610_s0 + $0x10] sm:$0xff]  }
   0x5   :  { %442 = vmatprep.mubr.bf16.mxu0 %v482_v4  ;;  %450 = vmatprep.mubr.bf16.mxu1 %v483_v5  ;;  %v485_v11 = vld [vmem:[%s610_s0 + $0x28] sm:$0xff]   ;;  %v487_v13 = vld [vmem:[%s610_s0 + $0x30] sm:$0xff]   ;;  %v488_v14 = vld [vmem:[%s610_s0 + $0x18] sm:$0xff]  }
   0x6   :  { %v489_v15 = vld [vmem:[%s610_s0 + $0x38] sm:$0xff]   ;;  %v409_v16 = vld [vmem:[%s611_s2] ss:$0 sm:$0xff] }
   0x7   :  { %429 = vmatpush3.bf16.msra.mxu0 %v475_v1  ;;  %467 = vmatpush3.bf16.msra.mxu1 %v475_v1 }
   0x8   :  { %430 = vmatprep.subr.bf16.mxu0 %v476_v2  ;;  %460 = vmatprep.subr.bf16.mxu1 %v476_v2 }
   0xb   :  { %431 = vmatpush3.bf16.msra.mxu0 %v476_v2  ;;  %468 = vmatpush3.bf16.msra.mxu1 %v476_v2 }
   0xc   :  { %432 = vmatprep.subr.bf16.mxu0 %v477_v3  ;;  %461 = vmatprep.subr.bf16.mxu1 %v477_v3 }
   0xf   :  { %433 = vmatpush3.bf16.msra.mxu0 %v477_v3  ;;  %469 = vmatpush3.bf16.msra.mxu1 %v477_v3 }
  0x10   :  { %434 = vmatprep.subr.bf16.mxu0 %v478_v6  ;;  %462 = vmatprep.subr.bf16.mxu1 %v478_v6 }
  0x13   :  { %435 = vmatpush3.bf16.msra.mxu0 %v478_v6  ;;  %470 = vmatpush3.bf16.msra.mxu1 %v478_v6 }
  0x14   :  { %436 = vmatprep.subr.bf16.mxu0 %v479_v7  ;;  %463 = vmatprep.subr.bf16.mxu1 %v479_v7 }
  0x17   :  { %437 = vmatpush3.bf16.msra.mxu0 %v479_v7  ;;  %471 = vmatpush3.bf16.msra.mxu1 %v479_v7 }
  0x18   :  { %438 = vmatprep.subr.bf16.mxu0 %v480_v8  ;;  %464 = vmatprep.subr.bf16.mxu1 %v480_v8 }
  0x1b   :  { %439 = vmatpush3.bf16.msra.mxu0 %v480_v8  ;;  %472 = vmatpush3.bf16.msra.mxu1 %v480_v8 }
  0x1c   :  { %440 = vmatprep.subr.bf16.mxu0 %v481_v9  ;;  %465 = vmatprep.subr.bf16.mxu1 %v481_v9 }
  0x1f   :  { %441 = vmatpush3.bf16.msra.mxu0 %v481_v9  ;;  %473 = vmatpush3.bf16.msra.mxu1 %v481_v9 }
  0x22   :  { %443 = vmatmul.mubr.bf16.vlgmr.msra.gmra.mrb[0].mxu0 %v484_v10  ;;  %451 = vmatmul.mubr.bf16.vlgmr.msra.gmra.mrb[0].mxu1 %v485_v11 }
  0x23   :  { %446 = vmatprep.mubr.bf16.mxu0 %v486_v12  ;;  %454 = vmatprep.mubr.bf16.mxu1 %v487_v13 }
  0x2a   :  { %447 = vmatmul.mubr.bf16.gmra.mrb[4].mxu0 %v488_v14  ;;  %455 = vmatmul.mubr.bf16.gmra.mrb[4].mxu1 %v489_v15 }
  0xf5   :  { %v444_v17 = vpop.f32.mrb[0].mxu0  ;;  %v452_v18 = vpop.f32.mrb[0].mxu1 }
  0xf6   :  { %v341_v19 = vadd.f32 %v444_v17, %v409_v16  ;;  %v349_v20 = vadd.f32 %v452_v18, %v409_v16  ;;  %v218_v21 = vpop.f32.mrb[1].mxu0  ;;  %v250_v22 = vpop.f32.mrb[1].mxu1 }
  0xf7   :  { %v339_v23 = vadd.f32 %v409_v16, %v218_v21  ;;  %v347_v24 = vadd.f32 %v409_v16, %v250_v22  ;;  %v445_v25 = vpop.f32.mrb[2].mxu0  ;;  %v453_v26 = vpop.f32.mrb[2].mxu1 }
  0xf8   :  { %v357_v27 = vmax.f32 %v341_v19, 0.0  ;;  %v365_v28 = vmax.f32 %v349_v20, 0.0  ;;  %v342_v29 = vadd.f32 %v445_v25, %v409_v16  ;;  %v350_v30 = vadd.f32 %v453_v26, %v409_v16  ;;  %v221_v31 = vpop.f32.mrb[3].mxu0  ;;  %v253_v32 = vpop.f32.mrb[3].mxu1 }
  0xf9   :  { %v355_v33 = vmax.f32 %v339_v23, 0.0  ;;  %v363_v34 = vmax.f32 %v347_v24, 0.0  ;;  %v340_v35 = vadd.f32 %v409_v16, %v221_v31  ;;  %v348_v36 = vadd.f32 %v409_v16, %v253_v32 }
  0xfa   :  { %373 = vst [vmem:[%s612_s3 + $0x10] sm:$0xff] %v357_v27  ;;  %381 = vst [vmem:[%s612_s3 + $0x50] sm:$0xff] %v365_v28  ;;  %v358_v37 = vmax.f32 %v342_v29, 0.0  ;;  %v366_v38 = vmax.f32 %v350_v30, 0.0 }
  0xfb   :  { %371 = vst [vmem:[%s612_s3] sm:$0xff] %v355_v33  ;;  %379 = vst [vmem:[%s612_s3 + $0x40] sm:$0xff] %v363_v34  ;;  %v356_v39 = vmax.f32 %v340_v35, 0.0  ;;  %v364_v40 = vmax.f32 %v348_v36, 0.0 }
  0xfc   :  { %374 = vst [vmem:[%s612_s3 + $0x18] sm:$0xff] %v358_v37  ;;  %382 = vst [vmem:[%s612_s3 + $0x58] sm:$0xff] %v366_v38 }
  0xfd   :  { %372 = vst [vmem:[%s612_s3 + $0x8] sm:$0xff] %v356_v39  ;;  %380 = vst [vmem:[%s612_s3 + $0x48] sm:$0xff] %v364_v40  ;;  %v448_v41 = vpop.f32.mrb[4].mxu0  ;;  %v456_v42 = vpop.f32.mrb[4].mxu1 }
  0xfe   :  { %v345_v43 = vadd.f32 %v448_v41, %v409_v16  ;;  %v353_v44 = vadd.f32 %v456_v42, %v409_v16  ;;  %v234_v45 = vpop.f32.mrb[5].mxu0  ;;  %v266_v46 = vpop.f32.mrb[5].mxu1 }
  0xff   :  { %v343_v47 = vadd.f32 %v409_v16, %v234_v45  ;;  %v351_v48 = vadd.f32 %v409_v16, %v266_v46  ;;  %v449_v49 = vpop.f32.mrb[6].mxu0  ;;  %v457_v50 = vpop.f32.mrb[6].mxu1 }
 0x100   :  { %v361_v51 = vmax.f32 %v345_v43, 0.0  ;;  %v369_v52 = vmax.f32 %v353_v44, 0.0  ;;  %v346_v53 = vadd.f32 %v449_v49, %v409_v16  ;;  %v354_v54 = vadd.f32 %v457_v50, %v409_v16  ;;  %v237_v55 = vpop.f32.mrb[7].mxu0  ;;  %v269_v56 = vpop.f32.mrb[7].mxu1 }
 0x101   :  { %v359_v57 = vmax.f32 %v343_v47, 0.0  ;;  %v367_v58 = vmax.f32 %v351_v48, 0.0  ;;  %v344_v59 = vadd.f32 %v409_v16, %v237_v55  ;;  %v352_v60 = vadd.f32 %v409_v16, %v269_v56 }
 0x102   :  { %377 = vst [vmem:[%s612_s3 + $0x30] sm:$0xff] %v361_v51  ;;  %385 = vst [vmem:[%s612_s3 + $0x70] sm:$0xff] %v369_v52  ;;  %v362_v61 = vmax.f32 %v346_v53, 0.0  ;;  %v370_v62 = vmax.f32 %v354_v54, 0.0 }
 0x103   :  { %375 = vst [vmem:[%s612_s3 + $0x20] sm:$0xff] %v359_v57  ;;  %383 = vst [vmem:[%s612_s3 + $0x60] sm:$0xff] %v367_v58  ;;  %v360_v63 = vmax.f32 %v344_v59, 0.0  ;;  %v368_v0 = vmax.f32 %v352_v60, 0.0 }
 0x104   :  { %378 = vst [vmem:[%s612_s3 + $0x38] sm:$0xff] %v362_v61  ;;  %386 = vst [vmem:[%s612_s3 + $0x78] sm:$0xff] %v370_v62 }
 0x105   :  { %376 = vst [vmem:[%s612_s3 + $0x28] sm:$0xff] %v360_v63  ;;  %384 = vst [vmem:[%s612_s3 + $0x68] sm:$0xff] %v368_v0 }

// kernel: vtxgnn_forward.25
= control target key start
LH: loop header
LB: loop body
LE: loop exit
PB: predicated region body
PF: predicated region fallthrough
CT: control target
= control target key end

     0   :  { %s997_s3 = inlined_call_operand.vmem [shape: f32[128,128], index: 3, kind: input, shape index: {}]   ;;  %s998_s2 = inlined_call_operand.vmem [shape: f32[128,128], index: 2, kind: input, shape index: {}]   ;;  %s999_s1 = inlined_call_operand.vmem [shape: f32[128,128], index: 1, kind: input, shape index: {}]   ;;  %s1000_s0 = inlined_call_operand.vmem [shape: f32[128,128], index: 0, kind: input, shape index: {}]   ;;  %s1001_s4 = inlined_call_operand.vmem [shape: f32[1,128], index: 4, kind: input, shape index: {}]   ;;  %s1002_s5 = inlined_call_operand.vmem [shape: f32[128,128], index: 5, kind: output, shape index: {}]  }
   0x1   :  { %v100_v0 = vld [vmem:[%s997_s3] sm:$0xff]  ;;  %v101_v1 = vld [vmem:[%s997_s3 + $0x8] sm:$0xff]  ;;  %v102_v5 = vld [vmem:[%s997_s3 + $0x10] sm:$0xff] }
   0x2   :  { %v84_v2 = vld [vmem:[%s998_s2] sm:$0xff]  ;;  %v626_v3 = vpack.c.bf16 %v101_v1, %v100_v0  ;;  %v85_v4 = vld [vmem:[%s998_s2 + $0x8] sm:$0xff]  ;;  %v103_v6 = vld [vmem:[%s997_s3 + $0x18] sm:$0xff] }
   0x3   :  { %v658_v7 = vpack.c.bf16 %v85_v4, %v84_v2  ;;  %v630_v8 = vpack.c.bf16 %v103_v6, %v102_v5  ;;  %v86_v9 = vld [vmem:[%s998_s2 + $0x10] sm:$0xff]  ;;  %v87_v10 = vld [vmem:[%s998_s2 + $0x18] sm:$0xff]  ;;  %v104_v11 = vld [vmem:[%s997_s3 + $0x20] sm:$0xff] }
   0x4   :  { %627 = vmatprep.subr.bf16.mxu1 %v626_v3  ;;  %v662_v12 = vpack.c.bf16 %v87_v10, %v86_v9  ;;  %v105_v13 = vld [vmem:[%s997_s3 + $0x28] sm:$0xff]  ;;  %v88_v14 = vld [vmem:[%s998_s2 + $0x20] sm:$0xff]  ;;  %v106_v18 = vld [vmem:[%s997_s3 + $0x30] sm:$0xff] }
   0x5   :  { %v89_v15 = vld [vmem:[%s998_s2 + $0x28] sm:$0xff]  ;;  %659 = vmatprep.subr.bf16.mxu0 %v658_v7  ;;  %629 = vmatpush3.bf16.msra.mxu1 %v626_v3  ;;  %v634_v16 = vpack.c.bf16 %v105_v13, %v104_v11  ;;  %v107_v19 = vld [vmem:[%s997_s3 + $0x38] sm:$0xff]  ;;  %v90_v20 = vld [vmem:[%s998_s2 + $0x30] sm:$0xff] }
   0x6   :  { %661 = vmatpush3.bf16.msra.mxu0 %v658_v7  ;;  %631 = vmatprep.subr.bf16.mxu1 %v630_v8  ;;  %v666_v17 = vpack.c.bf16 %v89_v15, %v88_v14  ;;  %v91_v21 = vld [vmem:[%s998_s2 + $0x38] sm:$0xff]  ;;  %v638_v22 = vpack.c.bf16 %v107_v19, %v106_v18  ;;  %v108_v24 = vld [vmem:[%s997_s3 + $0x40] sm:$0xff]  ;;  %v109_v25 = vld [vmem:[%s997_s3 + $0x48] sm:$0xff] }
   0x7   :  { %663 = vmatprep.subr.bf16.mxu0 %v662_v12  ;;  %v670_v23 = vpack.c.bf16 %v91_v21, %v90_v20  ;;  %v52_v26 = vld [vmem:[%s999_s1] sm:$0xff]  ;;  %v93_v28 = vld [vmem:[%s998_s2 + $0x48] sm:$0xff]  ;;  %v642_v32 = vpack.c.bf16 %v109_v25, %v108_v24  ;;  %v110_v34 = vld [vmem:[%s997_s3 + $0x50] sm:$0xff] }
   0x8   :  { %v92_v27 = vld [vmem:[%s998_s2 + $0x40] sm:$0xff]  ;;  %v68_v29 = vmax.f32 %v52_v26, 0.0  ;;  %v111_v35 = vld [vmem:[%s997_s3 + $0x58] sm:$0xff]  ;;  %v94_v36 = vld [vmem:[%s998_s2 + $0x50] sm:$0xff] }
   0x9   :  { %633 = vmatpush3.bf16.msra.mxu1 %v630_v8  ;;  %v20_v30 = vld [vmem:[%s1000_s0] sm:$0xff]  ;;  %v674_v33 = vpack.c.bf16 %v93_v28, %v92_v27  ;;  %v95_v37 = vld [vmem:[%s998_s2 + $0x58] sm:$0xff]  ;;  %v646_v38 = vpack.c.bf16 %v111_v35, %v110_v34  ;;  %v113_v41 = vld [vmem:[%s997_s3 + $0x68] sm:$0xff] }
   0xa   :  { %665 = vmatpush3.bf16.msra.mxu0 %v662_v12  ;;  %635 = vmatprep.subr.bf16.mxu1 %v634_v16  ;;  %v36_v31 = vmax.f32 %v20_v30, 0.0  ;;  %v678_v39 = vpack.c.bf16 %v95_v37, %v94_v36  ;;  %v112_v40 = vld [vmem:[%s997_s3 + $0x60] sm:$0xff]  ;;  %v97_v43 = vld [vmem:[%s998_s2 + $0x68] sm:$0xff]  ;;  %v114_v46 = vld [vmem:[%s997_s3 + $0x70] sm:$0xff] }
   0xb   :  { %667 = vmatprep.subr.bf16.mxu0 %v666_v17  ;;  %546 = vmatprep.mubr.f32.mxu1 %v68_v29  ;;  %v96_v42 = vld [vmem:[%s998_s2 + $0x60] sm:$0xff]  ;;  %v650_v44 = vpack.c.bf16 %v113_v41, %v112_v40  ;;  %v115_v47 = vld [vmem:[%s997_s3 + $0x78] sm:$0xff]  ;;  %v98_v48 = vld [vmem:[%s998_s2 + $0x70] sm:$0xff] }
   0xc   :  { %602 = vmatprep.mubr.f32.mxu0 %v36_v31  ;;  %v682_v45 = vpack.c.bf16 %v97_v43, %v96_v42  ;;  %v99_v49 = vld [vmem:[%s998_s2 + $0x78] sm:$0xff]  ;;  %v654_v50 = vpack.c.bf16 %v115_v47, %v114_v46  ;;  %v53_v52 = vld [vmem:[%s999_s1 + $0x8] sm:$0xff]  ;;  %v54_v54 = vld [vmem:[%s999_s1 + $0x10] sm:$0xff] }
   0xd   :  { %637 = vmatpush3.bf16.msra.mxu1 %v634_v16  ;;  %v686_v51 = vpack.c.bf16 %v99_v49, %v98_v48  ;;  %v21_v53 = vld [vmem:[%s1000_s0 + $0x8] sm:$0xff]  ;;  %v22_v55 = vld [vmem:[%s1000_s0 + $0x10] sm:$0xff]  ;;  %v69_v56 = vmax.f32 %v53_v52, 0.0  ;;  %v70_v58 = vmax.f32 %v54_v54, 0.0  ;;  %v55_v59 = vld [vmem:[%s999_s1 + $0x18] sm:$0xff] }
   0xe   :  { %669 = vmatpush3.bf16.msra.mxu0 %v666_v17  ;;  %639 = vmatprep.subr.bf16.mxu1 %v638_v22  ;;  %v37_v57 = vmax.f32 %v21_v53, 0.0  ;;  %v38_v60 = vmax.f32 %v22_v55, 0.0  ;;  %v23_v61 = vld [vmem:[%s1000_s0 + $0x18] sm:$0xff]  ;;  %v56_v62 = vld [vmem:[%s999_s1 + $0x20] sm:$0xff]  ;;  %v71_v0 = vmax.f32 %v55_v59, 0.0  ;;  %v57_v3 = vld [vmem:[%s999_s1 + $0x28] sm:$0xff] }
   0xf   :  { %671 = vmatprep.subr.bf16.mxu0 %v670_v23  ;;  %v24_v63 = vld [vmem:[%s1000_s0 + $0x20] sm:$0xff]  ;;  %v39_v1 = vmax.f32 %v23_v61, 0.0  ;;  %v72_v2 = vmax.f32 %v56_v62, 0.0  ;;  %v25_v5 = vld [vmem:[%s1000_s0 + $0x28] sm:$0xff]  ;;  %v58_v6 = vld [vmem:[%s999_s1 + $0x30] sm:$0xff]  ;;  %v73_v8 = vmax.f32 %v57_v3, 0.0 }
  0x10   :  { %v40_v4 = vmax.f32 %v24_v63, 0.0  ;;  %v26_v7 = vld [vmem:[%s1000_s0 + $0x30] sm:$0xff]  ;;  %v41_v9 = vmax.f32 %v25_v5, 0.0  ;;  %v74_v10 = vmax.f32 %v58_v6, 0.0  ;;  %v59_v11 = vld [vmem:[%s999_s1 + $0x38] sm:$0xff]  ;;  %v60_v14 = vld [vmem:[%s999_s1 + $0x40] sm:$0xff] }
  0x11   :  { %641 = vmatpush3.bf16.msra.mxu1 %v638_v22  ;;  %v42_v12 = vmax.f32 %v26_v7, 0.0  ;;  %v27_v13 = vld [vmem:[%s1000_s0 + $0x38] sm:$0xff]  ;;  %v28_v15 = vld [vmem:[%s1000_s0 + $0x40] sm:$0xff]  ;;  %v75_v16 = vmax.f32 %v59_v11, 0.0  ;;  %v76_v18 = vmax.f32 %v60_v14, 0.0  ;;  %v61_v19 = vld [vmem:[%s999_s1 + $0x48] sm:$0xff] }
  0x12   :  { %673 = vmatpush3.bf16.msra.mxu0 %v670_v23  ;;  %643 = vmatprep.subr.bf16.mxu1 %v642_v32  ;;  %v43_v17 = vmax.f32 %v27_v13, 0.0  ;;  %v44_v20 = vmax.f32 %v28_v15, 0.0  ;;  %v29_v21 = vld [vmem:[%s1000_s0 + $0x48] sm:$0xff]  ;;  %v62_v22 = vld [vmem:[%s999_s1 + $0x50] sm:$0xff]  ;;  %v77_v24 = vmax.f32 %v61_v19, 0.0  ;;  %v63_v27 = vld [vmem:[%s999_s1 + $0x58] sm:$0xff] }
  0x13   :  { %675 = vmatprep.subr.bf16.mxu0 %v674_v33  ;;  %v30_v23 = vld [vmem:[%s1000_s0 + $0x50] sm:$0xff]  ;;  %v45_v25 = vmax.f32 %v29_v21, 0.0  ;;  %v78_v26 = vmax.f32 %v62_v22, 0.0  ;;  %v31_v29 = vld [vmem:[%s1000_s0 + $0x58] sm:$0xff]  ;;  %v64_v30 = vld [vmem:[%s999_s1 + $0x60] sm:$0xff] }
  0x14   :  { %v46_v28 = vmax.f32 %v30_v23, 0.0  ;;  %v32_v31 = vld [vmem:[%s1000_s0 + $0x60] sm:$0xff]  ;;  %v80_v34 = vmax.f32 %v64_v30, 0.0  ;;  %v65_v35 = vld [vmem:[%s999_s1 + $0x68] sm:$0xff]  ;;  %v67_v43 = vld [vmem:[%s999_s1 + $0x78] sm:$0xff] }
  0x15   :  { %645 = vmatpush3.bf16.msra.mxu1 %v642_v32  ;;  %v79_v32 = vmax.f32 %v63_v27, 0.0  ;;  %v48_v36 = vmax.f32 %v32_v31, 0.0  ;;  %v33_v37 = vld [vmem:[%s1000_s0 + $0x68] sm:$0xff]  ;;  %v81_v40 = vmax.f32 %v65_v35, 0.0  ;;  %v83_v46 = vmax.f32 %v67_v43, 0.0 }
  0x16   :  { %677 = vmatpush3.bf16.msra.mxu0 %v674_v33  ;;  %647 = vmatprep.subr.bf16.mxu1 %v646_v38  ;;  %v47_v33 = vmax.f32 %v31_v29, 0.0  ;;  %v49_v41 = vmax.f32 %v33_v37, 0.0 }
  0x17   :  { %679 = vmatprep.subr.bf16.mxu0 %v678_v39 }
  0x19   :  { %649 = vmatpush3.bf16.msra.mxu1 %v646_v38  ;;  %v66_v38 = vld [vmem:[%s999_s1 + $0x70] sm:$0xff] }
  0x1a   :  { %681 = vmatpush3.bf16.msra.mxu0 %v678_v39  ;;  %651 = vmatprep.subr.bf16.mxu1 %v650_v44  ;;  %v34_v39 = vld [vmem:[%s1000_s0 + $0x70] sm:$0xff]  ;;  %v82_v42 = vmax.f32 %v66_v38, 0.0 }
  0x1b   :  { %683 = vmatprep.subr.bf16.mxu0 %v682_v45 }
  0x1d   :  { %653 = vmatpush3.bf16.msra.mxu1 %v650_v44  ;;  %v50_v44 = vmax.f32 %v34_v39, 0.0 }
  0x1e   :  { %685 = vmatpush3.bf16.msra.mxu0 %v682_v45  ;;  %655 = vmatprep.subr.bf16.mxu1 %v654_v50  ;;  %v35_v45 = vld [vmem:[%s1000_s0 + $0x78] sm:$0xff] }
  0x1f   :  { %687 = vmatprep.subr.bf16.mxu0 %v686_v51  ;;  %v51_v47 = vmax.f32 %v35_v45, 0.0 }
  0x21   :  { %657 = vmatpush3.bf16.msra.mxu1 %v654_v50  ;;  %v931_v50 = vld [vmem:[%s1001_s4] ss:$0 sm:$0xff] }
  0x22   :  { %689 = vmatpush3.bf16.msra.mxu0 %v686_v51 }
  0x24   :  { %547 = vmatmul.mubr.f32.vlgmr.msra.gmra.mrb[0].mxu1 %v69_v56 }
  0x25   :  { %603 = vmatmul.mubr.f32.vlgmr.msra.gmra.mrb[0].mxu0 %v37_v57  ;;  %549 = vmatprep.mubr.f32.mxu1 %v70_v58 }
  0x26   :  { %605 = vmatprep.mubr.f32.mxu0 %v38_v60 }
  0x28   :  { %550 = vmatmul.mubr.f32.gmra.mrb[2].mxu1 %v71_v0 }
  0x29   :  { %606 = vmatmul.mubr.f32.gmra.mrb[2].mxu0 %v39_v1  ;;  %552 = vmatprep.mubr.f32.mxu1 %v72_v2 }
  0x2a   :  { %608 = vmatprep.mubr.f32.mxu0 %v40_v4 }
  0x2c   :  { %553 = vmatmul.mubr.f32.gmra.mrb[4].mxu1 %v73_v8 }
  0x2d   :  { %609 = vmatmul.mubr.f32.gmra.mrb[4].mxu0 %v41_v9  ;;  %555 = vmatprep.mubr.f32.mxu1 %v74_v10 }
  0x2e   :  { %611 = vmatprep.mubr.f32.mxu0 %v42_v12 }
  0x30   :  { %556 = vmatmul.mubr.f32.gmra.mrb[6].mxu1 %v75_v16 }
  0x31   :  { %612 = vmatmul.mubr.f32.gmra.mrb[6].mxu0 %v43_v17  ;;  %558 = vmatprep.mubr.f32.mxu1 %v76_v18 }
  0x32   :  { %614 = vmatprep.mubr.f32.mxu0 %v44_v20 }
  0x34   :  { %559 = vmatmul.mubr.f32.gmra.mrb[8].mxu1 %v77_v24 }
  0x35   :  { %615 = vmatmul.mubr.f32.gmra.mrb[8].mxu0 %v45_v25  ;;  %561 = vmatprep.mubr.f32.mxu1 %v78_v26 }
  0x36   :  { %617 = vmatprep.mubr.f32.mxu0 %v46_v28 }
  0x38   :  { %562 = vmatmul.mubr.f32.gmra.mrb[10].mxu1 %v79_v32 }
  0x39   :  { %618 = vmatmul.mubr.f32.gmra.mrb[10].mxu0 %v47_v33  ;;  %564 = vmatprep.mubr.f32.mxu1 %v80_v34 }
  0x3a   :  { %620 = vmatprep.mubr.f32.mxu0 %v48_v36 }
  0x3c   :  { %565 = vmatmul.mubr.f32.gmra.mrb[12].mxu1 %v81_v40 }
  0x3d   :  { %621 = vmatmul.mubr.f32.gmra.mrb[12].mxu0 %v49_v41  ;;  %567 = vmatprep.mubr.f32.mxu1 %v82_v42 }
  0x3e   :  { %623 = vmatprep.mubr.f32.mxu0 %v50_v44 }
  0x40   :  { %568 = vmatmul.mubr.f32.gmra.mrb[14].mxu1 %v83_v46 }
  0x41   :  { %624 = vmatmul.mubr.f32.gmra.mrb[14].mxu0 %v51_v47 }
  0xf7   :  { %v548_v48 = vpop.f32.mrb[0].mxu1 }
  0xf8   :  { %v604_v49 = vpop.f32.mrb[0].mxu0  ;;  %v182_v51 = vpop.f32.mrb[1].mxu1 }
  0xf9   :  { %v333_v52 = vadd.f32 %v604_v49, %v548_v48  ;;  %v327_v53 = vpop.f32.mrb[1].mxu0 }
  0xfa   :  { %v328_v54 = vadd.f32 %v327_v53, %v182_v51 }
  0xfb   :  { %v414_v55 = vadd.f32 %v931_v50, %v333_v52  ;;  %v551_v56 = vpop.f32.mrb[2].mxu1 }
  0xfc   :  { %v413_v57 = vadd.f32 %v931_v50, %v328_v54  ;;  %v607_v58 = vpop.f32.mrb[2].mxu0  ;;  %v192_v59 = vpop.f32.mrb[3].mxu1 }
  0xfd   :  { %430 = vst [vmem:[%s1002_s5 + $0x8] sm:$0xff] %v414_v55  ;;  %v343_v60 = vadd.f32 %v607_v58, %v551_v56  ;;  %v337_v61 = vpop.f32.mrb[3].mxu0 }
  0xfe   :  { %429 = vst [vmem:[%s1002_s5] sm:$0xff] %v413_v57  ;;  %v338_v62 = vadd.f32 %v337_v61, %v192_v59 }
  0xff   :  { %v416_v63 = vadd.f32 %v931_v50, %v343_v60  ;;  %v554_v0 = vpop.f32.mrb[4].mxu1 }
 0x100   :  { %v415_v1 = vadd.f32 %v931_v50, %v338_v62  ;;  %v610_v2 = vpop.f32.mrb[4].mxu0  ;;  %v202_v3 = vpop.f32.mrb[5].mxu1 }
 0x101   :  { %432 = vst [vmem:[%s1002_s5 + $0x18] sm:$0xff] %v416_v63  ;;  %v353_v4 = vadd.f32 %v610_v2, %v554_v0  ;;  %v347_v5 = vpop.f32.mrb[5].mxu0 }
 0x102   :  { %431 = vst [vmem:[%s1002_s5 + $0x10] sm:$0xff] %v415_v1  ;;  %v348_v6 = vadd.f32 %v347_v5, %v202_v3 }
 0x103   :  { %v418_v7 = vadd.f32 %v931_v50, %v353_v4  ;;  %v557_v8 = vpop.f32.mrb[6].mxu1 }
 0x104   :  { %v417_v9 = vadd.f32 %v931_v50, %v348_v6  ;;  %v613_v10 = vpop.f32.mrb[6].mxu0  ;;  %v212_v11 = vpop.f32.mrb[7].mxu1 }
 0x105   :  { %434 = vst [vmem:[%s1002_s5 + $0x28] sm:$0xff] %v418_v7  ;;  %v363_v12 = vadd.f32 %v613_v10, %v557_v8  ;;  %v357_v13 = vpop.f32.mrb[7].mxu0 }
 0x106   :  { %433 = vst [vmem:[%s1002_s5 + $0x20] sm:$0xff] %v417_v9  ;;  %v358_v14 = vadd.f32 %v357_v13, %v212_v11 }
 0x107   :  { %v420_v15 = vadd.f32 %v931_v50, %v363_v12  ;;  %v560_v16 = vpop.f32.mrb[8].mxu1 }
 0x108   :  { %v419_v17 = vadd.f32 %v931_v50, %v358_v14  ;;  %v616_v18 = vpop.f32.mrb[8].mxu0  ;;  %v222_v19 = vpop.f32.mrb[9].mxu1 }
 0x109   :  { %436 = vst [vmem:[%s1002_s5 + $0x38] sm:$0xff] %v420_v15  ;;  %v373_v20 = vadd.f32 %v616_v18, %v560_v16  ;;  %v367_v21 = vpop.f32.mrb[9].mxu0 }
 0x10a   :  { %435 = vst [vmem:[%s1002_s5 + $0x30] sm:$0xff] %v419_v17  ;;  %v368_v22 = vadd.f32 %v367_v21, %v222_v19 }
 0x10b   :  { %v422_v23 = vadd.f32 %v931_v50, %v373_v20  ;;  %v563_v24 = vpop.f32.mrb[10].mxu1 }
 0x10c   :  { %v421_v25 = vadd.f32 %v931_v50, %v368_v22  ;;  %v619_v26 = vpop.f32.mrb[10].mxu0  ;;  %v232_v27 = vpop.f32.mrb[11].mxu1 }
 0x10d   :  { %438 = vst [vmem:[%s1002_s5 + $0x48] sm:$0xff] %v422_v23  ;;  %v383_v28 = vadd.f32 %v619_v26, %v563_v24  ;;  %v377_v29 = vpop.f32.mrb[11].mxu0 }
 0x10e   :  { %437 = vst [vmem:[%s1002_s5 + $0x40] sm:$0xff] %v421_v25  ;;  %v378_v30 = vadd.f32 %v377_v29, %v232_v27 }
 0x10f   :  { %v424_v31 = vadd.f32 %v931_v50, %v383_v28  ;;  %v566_v32 = vpop.f32.mrb[12].mxu1 }
 0x110   :  { %v423_v33 = vadd.f32 %v931_v50, %v378_v30  ;;  %v622_v34 = vpop.f32.mrb[12].mxu0  ;;  %v242_v35 = vpop.f32.mrb[13].mxu1 }
 0x111   :  { %440 = vst [vmem:[%s1002_s5 + $0x58] sm:$0xff] %v424_v31  ;;  %v393_v36 = vadd.f32 %v622_v34, %v566_v32  ;;  %v387_v37 = vpop.f32.mrb[13].mxu0 }
 0x112   :  { %439 = vst [vmem:[%s1002_s5 + $0x50] sm:$0xff] %v423_v33  ;;  %v388_v38 = vadd.f32 %v387_v37, %v242_v35 }
 0x113   :  { %v426_v39 = vadd.f32 %v931_v50, %v393_v36  ;;  %v569_v40 = vpop.f32.mrb[14].mxu1 }
 0x114   :  { %v425_v41 = vadd.f32 %v931_v50, %v388_v38  ;;  %v625_v42 = vpop.f32.mrb[14].mxu0  ;;  %v252_v43 = vpop.f32.mrb[15].mxu1 }
 0x115   :  { %442 = vst [vmem:[%s1002_s5 + $0x68] sm:$0xff] %v426_v39  ;;  %v403_v44 = vadd.f32 %v625_v42, %v569_v40  ;;  %v397_v45 = vpop.f32.mrb[15].mxu0 }
 0x116   :  { %441 = vst [vmem:[%s1002_s5 + $0x60] sm:$0xff] %v425_v41  ;;  %v398_v46 = vadd.f32 %v397_v45, %v252_v43 }
 0x117   :  { %v428_v47 = vadd.f32 %v931_v50, %v403_v44 }
 0x118   :  { %v427_v48 = vadd.f32 %v931_v50, %v398_v46 }
 0x119   :  { %444 = vst [vmem:[%s1002_s5 + $0x78] sm:$0xff] %v428_v47 }
 0x11a   :  { %443 = vst [vmem:[%s1002_s5 + $0x70] sm:$0xff] %v427_v48 }

// kernel: vtxgnn_forward.24
= control target key start
LH: loop header
LB: loop body
LE: loop exit
PB: predicated region body
PF: predicated region fallthrough
CT: control target
= control target key end

     0   :  { %s949_s1 = inlined_call_operand.vmem [shape: bf16[128,128], index: 1, kind: input, shape index: {}]   ;;  %s950_s0 = inlined_call_operand.vmem [shape: bf16[128,128], index: 0, kind: input, shape index: {}]   ;;  %s951_s3 = inlined_call_operand.vmem [shape: f32[128,128], index: 3, kind: input, shape index: {}]   ;;  %s952_s2 = inlined_call_operand.vmem [shape: f32[1,128], index: 2, kind: input, shape index: {}]   ;;  %s953_s4 = inlined_call_operand.vmem [shape: f32[1,128], index: 4, kind: input, shape index: {}]   ;;  %s954_s5 = inlined_call_operand.vmem [shape: f32[128,128], index: 5, kind: output, shape index: {}]  }
   0x1   :  { %v753_v0 = vld [vmem:[%s949_s1] sm:$0xff]   ;;  %v754_v1 = vld [vmem:[%s949_s1 + $0x8] sm:$0xff]   ;;  %v755_v2 = vld [vmem:[%s949_s1 + $0x10] sm:$0xff]  }
   0x2   :  { %633 = vmatprep.subr.bf16.mxu0 %v753_v0  ;;  %v756_v3 = vld [vmem:[%s949_s1 + $0x18] sm:$0xff]   ;;  %v761_v4 = vld [vmem:[%s950_s0] sm:$0xff]   ;;  %v758_v6 = vld [vmem:[%s949_s1 + $0x28] sm:$0xff]  }
   0x3   :  { %634 = vmatpush3.bf16.msra.mxu0 %v753_v0  ;;  %649 = vmatprep.mubr.bf16.mxu0 %v761_v4  ;;  %v757_v5 = vld [vmem:[%s949_s1 + $0x20] sm:$0xff]   ;;  %v378_v8 = vld [vmem:[%s951_s3 + $0x8] sm:$0xff]  ;;  %v379_v9 = vld [vmem:[%s951_s3 + $0x10] sm:$0xff] }
   0x4   :  { %635 = vmatprep.subr.bf16.mxu0 %v754_v1  ;;  %v377_v7 = vld [vmem:[%s951_s3] sm:$0xff]  ;;  %v380_v11 = vld [vmem:[%s951_s3 + $0x18] sm:$0xff]  ;;  %v382_v14 = vld [vmem:[%s951_s3 + $0x28] sm:$0xff] }
   0x5   :  { %v721_v10 = vpack.c.bf16 %v378_v8, %v377_v7  ;;  %v725_v12 = vpack.c.bf16 %v380_v11, %v379_v9  ;;  %v381_v13 = vld [vmem:[%s951_s3 + $0x20] sm:$0xff]  ;;  %v759_v15 = vld [vmem:[%s949_s1 + $0x30] sm:$0xff]   ;;  %v384_v18 = vld [vmem:[%s951_s3 + $0x38] sm:$0xff] }
   0x6   :  { %v729_v16 = vpack.c.bf16 %v382_v14, %v381_v13  ;;  %v383_v17 = vld [vmem:[%s951_s3 + $0x30] sm:$0xff]  ;;  %v760_v19 = vld [vmem:[%s949_s1 + $0x38] sm:$0xff]   ;;  %v385_v21 = vld [vmem:[%s951_s3 + $0x40] sm:$0xff] }
   0x7   :  { %636 = vmatpush3.bf16.msra.mxu0 %v754_v1  ;;  %722 = vmatprep.subr.bf16.mxu1 %v721_v10  ;;  %v733_v20 = vpack.c.bf16 %v384_v18, %v383_v17  ;;  %v386_v22 = vld [vmem:[%s951_s3 + $0x48] sm:$0xff]  ;;  %v387_v25 = vld [vmem:[%s951_s3 + $0x50] sm:$0xff]  ;;  %v388_v26 = vld [vmem:[%s951_s3 + $0x58] sm:$0xff] }
   0x8   :  { %637 = vmatprep.subr.bf16.mxu0 %v755_v2  ;;  %724 = vmatpush3.bf16.msra.mxu1 %v721_v10  ;;  %v737_v23 = vpack.c.bf16 %v386_v22, %v385_v21  ;;  %v762_v24 = vld [vmem:[%s950_s0 + $0x8] sm:$0xff]   ;;  %v763_v27 = vld [vmem:[%s950_s0 + $0x10] sm:$0xff]   ;;  %v741_v28 = vpack.c.bf16 %v388_v26, %v387_v25  ;;  %v764_v29 = vld [vmem:[%s950_s0 + $0x18] sm:$0xff]  }
   0x9   :  { %726 = vmatprep.subr.bf16.mxu1 %v725_v12  ;;  %v765_v30 = vld [vmem:[%s950_s0 + $0x20] sm:$0xff]   ;;  %v766_v31 = vld [vmem:[%s950_s0 + $0x28] sm:$0xff]   ;;  %v767_v32 = vld [vmem:[%s950_s0 + $0x30] sm:$0xff]  }
   0xa   :  { %v768_v33 = vld [vmem:[%s950_s0 + $0x38] sm:$0xff]   ;;  %v389_v34 = vld [vmem:[%s951_s3 + $0x60] sm:$0xff]  ;;  %v390_v35 = vld [vmem:[%s951_s3 + $0x68] sm:$0xff] }
   0xb   :  { %638 = vmatpush3.bf16.msra.mxu0 %v755_v2  ;;  %v745_v36 = vpack.c.bf16 %v390_v35, %v389_v34  ;;  %v391_v37 = vld [vmem:[%s951_s3 + $0x70] sm:$0xff]  ;;  %v392_v38 = vld [vmem:[%s951_s3 + $0x78] sm:$0xff]  ;;  %v583_v40 = vld [vmem:[%s952_s2] ss:$0 sm:$0xff] }
   0xc   :  { %639 = vmatprep.subr.bf16.mxu0 %v756_v3  ;;  %728 = vmatpush3.bf16.msra.mxu1 %v725_v12  ;;  %v749_v39 = vpack.c.bf16 %v392_v38, %v391_v37  ;;  %v584_v25 = vld [vmem:[%s953_s4] ss:$0 sm:$0xff] }
   0xd   :  { %730 = vmatprep.subr.bf16.mxu1 %v729_v16 }
   0xf   :  { %640 = vmatpush3.bf16.msra.mxu0 %v756_v3 }
  0x10   :  { %641 = vmatprep.subr.bf16.mxu0 %v757_v5  ;;  %732 = vmatpush3.bf16.msra.mxu1 %v729_v16 }
  0x11   :  { %734 = vmatprep.subr.bf16.mxu1 %v733_v20 }
  0x13   :  { %642 = vmatpush3.bf16.msra.mxu0 %v757_v5 }
  0x14   :  { %643 = vmatprep.subr.bf16.mxu0 %v758_v6  ;;  %736 = vmatpush3.bf16.msra.mxu1 %v733_v20 }
  0x15   :  { %738 = vmatprep.subr.bf16.mxu1 %v737_v23 }
  0x17   :  { %644 = vmatpush3.bf16.msra.mxu0 %v758_v6 }
  0x18   :  { %645 = vmatprep.subr.bf16.mxu0 %v759_v15  ;;  %740 = vmatpush3.bf16.msra.mxu1 %v737_v23 }
  0x19   :  { %742 = vmatprep.subr.bf16.mxu1 %v741_v28 }
  0x1b   :  { %646 = vmatpush3.bf16.msra.mxu0 %v759_v15 }
  0x1c   :  { %647 = vmatprep.subr.bf16.mxu0 %v760_v19  ;;  %744 = vmatpush3.bf16.msra.mxu1 %v741_v28 }
  0x1d   :  { %746 = vmatprep.subr.bf16.mxu1 %v745_v36 }
  0x1f   :  { %648 = vmatpush3.bf16.msra.mxu0 %v760_v19 }
  0x20   :  { %748 = vmatpush3.bf16.msra.mxu1 %v745_v36 }
  0x21   :  { %750 = vmatprep.subr.bf16.mxu1 %v749_v39 }
  0x22   :  { %650 = vmatmul.mubr.bf16.vlgmr.msra.gmra.mrb[0].mxu0 %v762_v24 }
  0x23   :  { %653 = vmatprep.mubr.bf16.mxu0 %v763_v27 }
  0x24   :  { %752 = vmatpush3.bf16.msra.mxu1 %v749_v39 }
  0x2a   :  { %654 = vmatmul.mubr.bf16.gmra.mrb[4].mxu0 %v764_v29 }
  0x2b   :  { %657 = vmatprep.mubr.bf16.mxu0 %v765_v30 }
  0x32   :  { %658 = vmatmul.mubr.bf16.gmra.mrb[8].mxu0 %v766_v31 }
  0x33   :  { %661 = vmatprep.mubr.bf16.mxu0 %v767_v32 }
  0x3a   :  { %662 = vmatmul.mubr.bf16.gmra.mrb[12].mxu0 %v768_v33 }
  0xf5   :  { %v651_v41 = vpop.f32.mrb[0].mxu0 }
  0xf6   :  { %v224_v42 = vpop.f32.mrb[1].mxu0  ;;  %v347_v45 = vadd.f32 %v651_v41, %v583_v40 }
  0xf7   :  { %v652_v43 = vpop.f32.mrb[2].mxu0  ;;  %v345_v44 = vadd.f32 %v583_v40, %v224_v42 }
  0xf8   :  { %v227_v46 = vpop.f32.mrb[3].mxu0  ;;  %v348_v49 = vadd.f32 %v652_v43, %v583_v40  ;;  %v363_v51 = vmax.f32 %v347_v45, 0.0 }
  0xf9   :  { %v346_v47 = vadd.f32 %v583_v40, %v227_v46  ;;  %v361_v48 = vmax.f32 %v345_v44, 0.0 }
  0xfa   :  { %v364_v54 = vmax.f32 %v348_v49, 0.0 }
  0xfb   :  { %v362_v50 = vmax.f32 %v346_v47, 0.0  ;;  %697 = vmatprep.mubr.f32.mxu1 %v361_v48 }
  0xfd   :  { %v655_v52 = vpop.f32.mrb[4].mxu0  ;;  %698 = vmatmul.mubr.f32.vlgmr.msra.gmra.mrb[0].mxu1 %v362_v50 }
  0xfe   :  { %v240_v53 = vpop.f32.mrb[5].mxu0  ;;  %700 = vmatprep.mubr.f32.mxu1 %v363_v51  ;;  %v351_v57 = vadd.f32 %v655_v52, %v583_v40 }
  0xff   :  { %v349_v55 = vadd.f32 %v583_v40, %v240_v53  ;;  %v656_v56 = vpop.f32.mrb[6].mxu0 }
 0x100   :  { %v243_v58 = vpop.f32.mrb[7].mxu0  ;;  %v352_v61 = vadd.f32 %v656_v56, %v583_v40  ;;  %v367_v63 = vmax.f32 %v351_v57, 0.0 }
 0x101   :  { %v365_v59 = vmax.f32 %v349_v55, 0.0  ;;  %v350_v60 = vadd.f32 %v583_v40, %v243_v58  ;;  %701 = vmatmul.mubr.f32.gmra.mrb[2].mxu1 %v364_v54 }
 0x102   :  { %v368_v2 = vmax.f32 %v352_v61, 0.0 }
 0x103   :  { %v366_v62 = vmax.f32 %v350_v60, 0.0  ;;  %703 = vmatprep.mubr.f32.mxu1 %v365_v59 }
 0x105   :  { %v659_v0 = vpop.f32.mrb[8].mxu0  ;;  %704 = vmatmul.mubr.f32.gmra.mrb[4].mxu1 %v366_v62 }
 0x106   :  { %v256_v1 = vpop.f32.mrb[9].mxu0  ;;  %706 = vmatprep.mubr.f32.mxu1 %v367_v63  ;;  %v355_v5 = vadd.f32 %v659_v0, %v583_v40 }
 0x107   :  { %v353_v3 = vadd.f32 %v583_v40, %v256_v1  ;;  %v660_v4 = vpop.f32.mrb[10].mxu0 }
 0x108   :  { %v259_v6 = vpop.f32.mrb[11].mxu0  ;;  %v356_v9 = vadd.f32 %v660_v4, %v583_v40  ;;  %v371_v11 = vmax.f32 %v355_v5, 0.0 }
 0x109   :  { %v369_v7 = vmax.f32 %v353_v3, 0.0  ;;  %v354_v8 = vadd.f32 %v583_v40, %v259_v6  ;;  %707 = vmatmul.mubr.f32.gmra.mrb[6].mxu1 %v368_v2 }
 0x10a   :  { %v372_v14 = vmax.f32 %v356_v9, 0.0 }
 0x10b   :  { %v370_v10 = vmax.f32 %v354_v8, 0.0  ;;  %709 = vmatprep.mubr.f32.mxu1 %v369_v7 }
 0x10d   :  { %v663_v12 = vpop.f32.mrb[12].mxu0  ;;  %710 = vmatmul.mubr.f32.gmra.mrb[8].mxu1 %v370_v10 }
 0x10e   :  { %v272_v13 = vpop.f32.mrb[13].mxu0  ;;  %712 = vmatprep.mubr.f32.mxu1 %v371_v11  ;;  %v359_v17 = vadd.f32 %v663_v12, %v583_v40 }
 0x10f   :  { %v357_v15 = vadd.f32 %v583_v40, %v272_v13  ;;  %v664_v16 = vpop.f32.mrb[14].mxu0 }
 0x110   :  { %v275_v18 = vpop.f32.mrb[15].mxu0  ;;  %v360_v21 = vadd.f32 %v664_v16, %v583_v40  ;;  %v375_v23 = vmax.f32 %v359_v17, 0.0 }
 0x111   :  { %v373_v19 = vmax.f32 %v357_v15, 0.0  ;;  %v358_v20 = vadd.f32 %v583_v40, %v275_v18  ;;  %713 = vmatmul.mubr.f32.gmra.mrb[10].mxu1 %v372_v14 }
 0x112   :  { %v376_v24 = vmax.f32 %v360_v21, 0.0 }
 0x113   :  { %v374_v22 = vmax.f32 %v358_v20, 0.0  ;;  %715 = vmatprep.mubr.f32.mxu1 %v373_v19 }
 0x115   :  { %716 = vmatmul.mubr.f32.gmra.mrb[12].mxu1 %v374_v22 }
 0x116   :  { %718 = vmatprep.mubr.f32.mxu1 %v375_v23 }
 0x119   :  { %719 = vmatmul.mubr.f32.gmra.mrb[14].mxu1 %v376_v24 }
 0x1d0   :  { %v699_v26 = vpop.f32.mrb[0].mxu1 }
 0x1d1   :  { %v472_v27 = vadd.f32 %v699_v26, %v584_v25  ;;  %v466_v28 = vpop.f32.mrb[1].mxu1 }
 0x1d2   :  { %v467_v29 = vadd.f32 %v584_v25, %v466_v28 }
 0x1d3   :  { %546 = vst [vmem:[%s954_s5 + $0x8] sm:$0xff] %v472_v27 }
 0x1d4   :  { %545 = vst [vmem:[%s954_s5] sm:$0xff] %v467_v29  ;;  %v702_v30 = vpop.f32.mrb[2].mxu1 }
 0x1d5   :  { %v482_v31 = vadd.f32 %v702_v30, %v584_v25  ;;  %v476_v32 = vpop.f32.mrb[3].mxu1 }
 0x1d6   :  { %v477_v33 = vadd.f32 %v584_v25, %v476_v32 }
 0x1d7   :  { %548 = vst [vmem:[%s954_s5 + $0x18] sm:$0xff] %v482_v31 }
 0x1d8   :  { %547 = vst [vmem:[%s954_s5 + $0x10] sm:$0xff] %v477_v33  ;;  %v705_v34 = vpop.f32.mrb[4].mxu1 }
 0x1d9   :  { %v492_v35 = vadd.f32 %v705_v34, %v584_v25  ;;  %v486_v36 = vpop.f32.mrb[5].mxu1 }
 0x1da   :  { %v487_v37 = vadd.f32 %v584_v25, %v486_v36 }
 0x1db   :  { %550 = vst [vmem:[%s954_s5 + $0x28] sm:$0xff] %v492_v35 }
 0x1dc   :  { %549 = vst [vmem:[%s954_s5 + $0x20] sm:$0xff] %v487_v37  ;;  %v708_v38 = vpop.f32.mrb[6].mxu1 }
 0x1dd   :  { %v502_v39 = vadd.f32 %v708_v38, %v584_v25  ;;  %v496_v40 = vpop.f32.mrb[7].mxu1 }
 0x1de   :  { %v497_v41 = vadd.f32 %v584_v25, %v496_v40 }
 0x1df   :  { %552 = vst [vmem:[%s954_s5 + $0x38] sm:$0xff] %v502_v39 }
 0x1e0   :  { %551 = vst [vmem:[%s954_s5 + $0x30] sm:$0xff] %v497_v41  ;;  %v711_v42 = vpop.f32.mrb[8].mxu1 }
 0x1e1   :  { %v512_v43 = vadd.f32 %v711_v42, %v584_v25  ;;  %v506_v44 = vpop.f32.mrb[9].mxu1 }
 0x1e2   :  { %v507_v45 = vadd.f32 %v584_v25, %v506_v44 }
 0x1e3   :  { %554 = vst [vmem:[%s954_s5 + $0x48] sm:$0xff] %v512_v43 }
 0x1e4   :  { %553 = vst [vmem:[%s954_s5 + $0x40] sm:$0xff] %v507_v45  ;;  %v714_v46 = vpop.f32.mrb[10].mxu1 }
 0x1e5   :  { %v522_v47 = vadd.f32 %v714_v46, %v584_v25  ;;  %v516_v48 = vpop.f32.mrb[11].mxu1 }
 0x1e6   :  { %v517_v49 = vadd.f32 %v584_v25, %v516_v48 }
 0x1e7   :  { %556 = vst [vmem:[%s954_s5 + $0x58] sm:$0xff] %v522_v47 }
 0x1e8   :  { %555 = vst [vmem:[%s954_s5 + $0x50] sm:$0xff] %v517_v49  ;;  %v717_v50 = vpop.f32.mrb[12].mxu1 }
 0x1e9   :  { %v532_v51 = vadd.f32 %v717_v50, %v584_v25  ;;  %v526_v52 = vpop.f32.mrb[13].mxu1 }
 0x1ea   :  { %v527_v53 = vadd.f32 %v584_v25, %v526_v52 }
 0x1eb   :  { %558 = vst [vmem:[%s954_s5 + $0x68] sm:$0xff] %v532_v51 }
 0x1ec   :  { %557 = vst [vmem:[%s954_s5 + $0x60] sm:$0xff] %v527_v53  ;;  %v720_v54 = vpop.f32.mrb[14].mxu1 }
 0x1ed   :  { %v542_v55 = vadd.f32 %v720_v54, %v584_v25  ;;  %v536_v56 = vpop.f32.mrb[15].mxu1 }
 0x1ee   :  { %v537_v57 = vadd.f32 %v584_v25, %v536_v56 }
 0x1ef   :  { %560 = vst [vmem:[%s954_s5 + $0x78] sm:$0xff] %v542_v55 }
 0x1f0   :  { %559 = vst [vmem:[%s954_s5 + $0x70] sm:$0xff] %v537_v57 }

</bundles_post_ra>
